<compile_context>
chip_gen: v7x
topology: tpu7x:2x2x1
jax: 0.10.0
libtpu: 0.0.40
codegen_flags: <defaults>
</compile_context>

<pallas_src>
import math

import jax
import jax.numpy as jnp
from jax import lax
from jax.experimental import pallas as pl
from jax.experimental.pallas import tpu as pltpu

# ---------------------------------------------------------------------------
# Config
# ---------------------------------------------------------------------------
BATCH = 2
SEQ = 8
HIDDEN = 32
NUM_HEADS = 4
HEAD_DIM = HIDDEN // NUM_HEADS
INTERMEDIATE = 64
NUM_LAYERS = 2
VOCAB = 128
MAX_POS = 16
NUM_LABELS = 2
LABEL_PAD = 128          # lane-dense padded classifier output width
LN_EPS = 1e-12


# ---------------------------------------------------------------------------
# Shared math helpers (used both inside the kernel and by the pure-JAX reference)
# ---------------------------------------------------------------------------
def _layer_norm(x, gamma, beta):
    mu = jnp.mean(x, axis=-1, keepdims=True)
    xc = x - mu
    var = jnp.mean(xc * xc, axis=-1, keepdims=True)
    return xc * lax.rsqrt(var + LN_EPS) * gamma + beta


def _gelu_tanh(x):
    c = math.sqrt(2.0 / math.pi)
    return 0.5 * x * (1.0 + jnp.tanh(c * (x + 0.044715 * x * x * x)))


def _bf16(x):
    return x.astype(jnp.bfloat16)


# ---------------------------------------------------------------------------
# Fused whole-model kernel (one grid step == one sequence)
# ---------------------------------------------------------------------------
def _bert_kernel(
    ids_ref, pos_ref, mask_ref,
    wemb_ref, pemb_ref, temb_ref, lne_g_ref, lne_b_ref,
    wqkv_ref, bqkv_ref, wo_ref, bo_ref, ln1g_ref, ln1b_ref,
    wff1_ref, bff1_ref, wff2_ref, bff2_ref, ln2g_ref, ln2b_ref,
    wpool_ref, bpool_ref, wcls_ref, bcls_ref,
    out_ref,
):
    f32 = jnp.float32

    # ---- fused embedding lookup (word + position + token-type) + LayerNorm ----
    # gather expressed as one-hot @ table: a single MXU pass, rows stay in VMEM.
    ids = ids_ref[...]                                                   # (S, 1) int32
    word_oh = (ids == lax.broadcasted_iota(jnp.int32, (SEQ, VOCAB), 1)).astype(f32)
    pos_oh = (pos_ref[...] == lax.broadcasted_iota(jnp.int32, (SEQ, MAX_POS), 1)).astype(f32)
    x = jnp.dot(word_oh, wemb_ref[...], preferred_element_type=f32)
    x = x + jnp.dot(pos_oh, pemb_ref[...], preferred_element_type=f32)
    x = x + temb_ref[...]                                                # token_type_ids == 0
    x = _layer_norm(x, lne_g_ref[...], lne_b_ref[...])                   # (S, H) f32

    # additive attention mask, broadcast over heads and query positions
    m_add = (mask_ref[...] - 1.0) * 1e9                                  # (1, 1, S)

    scale = 1.0 / math.sqrt(HEAD_DIM)

    for l in range(NUM_LAYERS):
        # ---- fused QKV projection: one (S,H) x (H,3H) MXU pass + fused bias ----
        qkv = jnp.dot(_bf16(x), _bf16(wqkv_ref[l]),
                      preferred_element_type=f32) + bqkv_ref[l]          # (S, 3H)
        q = qkv[:, 0:HIDDEN] * scale
        k = qkv[:, HIDDEN:2 * HIDDEN]
        v = qkv[:, 2 * HIDDEN:3 * HIDDEN]

        # fold heads onto the einsum batch axis: (NH, S, HD)
        def _heads(t):
            return jnp.stack(
                [t[:, h * HEAD_DIM:(h + 1) * HEAD_DIM] for h in range(NUM_HEADS)],
                axis=0)

        qh, kh, vh = _heads(q), _heads(k), _heads(v)

        # one batched score matmul over all heads
        scores = jnp.einsum('hqd,hkd->hqk', _bf16(qh), _bf16(kh),
                            preferred_element_type=f32)                  # (NH, S, S)
        scores = scores + m_add                                          # mask padded keys

        # numerically-stable softmax; stats in f32, denominator on the EUP
        m = jnp.max(scores, axis=-1, keepdims=True)
        p = jnp.exp(scores - m)
        p = p * pl.reciprocal(jnp.sum(p, axis=-1, keepdims=True), approx=True)

        # one batched context matmul over all heads
        ctx = jnp.einsum('hqk,hkd->hqd', _bf16(p), _bf16(vh),
                         preferred_element_type=f32)                     # (NH, S, HD)
        ctx = jnp.concatenate([ctx[h] for h in range(NUM_HEADS)], axis=-1)  # (S, H)

        # ---- attention output proj + bias + residual + LayerNorm ----
        attn = jnp.dot(_bf16(ctx), _bf16(wo_ref[l]),
                       preferred_element_type=f32) + bo_ref[l]
        x = _layer_norm(x + attn, ln1g_ref[l], ln1b_ref[l])

        # ---- fused FFN: up-proj + GELU(tanh), down-proj + bias + residual + LN ----
        h1 = jnp.dot(_bf16(x), _bf16(wff1_ref[l]),
                     preferred_element_type=f32) + bff1_ref[l]
        h1 = _gelu_tanh(h1)
        ffn = jnp.dot(_bf16(h1), _bf16(wff2_ref[l]),
                      preferred_element_type=f32) + bff2_ref[l]
        x = _layer_norm(x + ffn, ln2g_ref[l], ln2b_ref[l])

    # ---- pooler (token 0 -> dense -> tanh) + classifier head (lane-padded) ----
    # dropout(p=0.1) is an identity at inference time and is removed entirely.
    # TODO(synk): training-mode dropout (stateful PRNG mask) is not implemented.
    cls_tok = x[0:1, :]                                                  # (1, H)
    pooled = jnp.tanh(
        jnp.dot(_bf16(cls_tok), _bf16(wpool_ref[...]),
                preferred_element_type=f32) + bpool_ref[...])
    logits = jnp.dot(_bf16(pooled), _bf16(wcls_ref[...]),
                     preferred_element_type=f32) + bcls_ref[...]         # (1, LABEL_PAD)
    out_ref[...] = logits[None]                                          # (1, 1, LABEL_PAD)


# ---------------------------------------------------------------------------
# Wrapper
# ---------------------------------------------------------------------------
def _resident_spec(shape):
    """Full-array block whose index_map is constant in the grid index -> stays in VMEM."""
    zeros = (0,) * len(shape)
    return pl.BlockSpec(shape, lambda b, _z=zeros: _z)


@jax.jit
def bert_classifier_forward(params, input_ids, attention_mask):
    """Fused Pallas forward pass of BertClassifier. Returns (BATCH, NUM_LABELS) logits."""
    ids = input_ids.reshape(BATCH * SEQ, 1).astype(jnp.int32)
    pos = jnp.arange(SEQ, dtype=jnp.int32).reshape(SEQ, 1)
    mask = attention_mask.astype(jnp.float32).reshape(BATCH, 1, SEQ)

    # lane-pad the (H, 2) classifier so the kernel's only HBM store is 128-lane dense
    w_cls_pad = jnp.zeros((HIDDEN, LABEL_PAD), jnp.float32).at[:, :NUM_LABELS].set(params['w_cls'])
    b_cls_pad = jnp.zeros((1, LABEL_PAD), jnp.float32).at[:, :NUM_LABELS].set(params['b_cls'])

    inputs = (
        ids, pos, mask,
        params['word_emb'], params['pos_emb'], params['type_emb'],
        params['ln_e_g'], params['ln_e_b'],
        params['wqkv'], params['bqkv'], params['wo'], params['bo'],
        params['ln1_g'], params['ln1_b'],
        params['wff1'], params['bff1'], params['wff2'], params['bff2'],
        params['ln2_g'], params['ln2_b'],
        params['w_pool'], params['b_pool'], w_cls_pad, b_cls_pad,
    )

    in_specs = [
        pl.BlockSpec((SEQ, 1), lambda b: (b, 0)),          # token ids of sequence b
        pl.BlockSpec((SEQ, 1), lambda b: (0, 0)),          # position ids (shared)
        pl.BlockSpec((1, 1, SEQ), lambda b: (b, 0, 0)),    # attention mask of sequence b
    ] + [_resident_spec(a.shape) for a in inputs[3:]]      # all weights resident in VMEM

    out = pl.pallas_call(
        _bert_kernel,
        out_shape=jax.ShapeDtypeStruct((BATCH, 1, LABEL_PAD), jnp.float32),
        grid_spec=pltpu.PrefetchScalarGridSpec(
            num_scalar_prefetch=0,
            grid=(BATCH,),
            in_specs=in_specs,
            out_specs=pl.BlockSpec((1, 1, LABEL_PAD), lambda b: (b, 0, 0)),
        ),
        compiler_params=pltpu.CompilerParams(
            dimension_semantics=("parallel",),             # shard sequences across TCs (v7x)
        ),
    )(*inputs)
    return out[:, 0, :NUM_LABELS]


# ---------------------------------------------------------------------------
# Pure-JAX reference (same math, f32 end-to-end) for a correctness check
# ---------------------------------------------------------------------------
def bert_reference(params, input_ids, attention_mask):
    x = params['word_emb'][input_ids]                                    # (B, S, H)
    x = x + params['pos_emb'][jnp.arange(SEQ)][None]
    x = x + params['type_emb'][0][None, None, :]
    x = _layer_norm(x, params['ln_e_g'], params['ln_e_b'])
    m_add = (attention_mask.astype(jnp.float32) - 1.0) * 1e9
    scale = 1.0 / math.sqrt(HEAD_DIM)

    def split(t):
        return t.reshape(BATCH, SEQ, NUM_HEADS, HEAD_DIM).transpose(0, 2, 1, 3)

    for l in range(NUM_LAYERS):
        qkv = x @ params['wqkv'][l] + params['bqkv'][l]
        q, k, v = (qkv[..., :HIDDEN], qkv[..., HIDDEN:2 * HIDDEN], qkv[..., 2 * HIDDEN:])
        s = jnp.einsum('bhqd,bhkd->bhqk', split(q), split(k)) * scale
        s = s + m_add[:, None, None, :]
        p = jax.nn.softmax(s, axis=-1)
        ctx = jnp.einsum('bhqk,bhkd->bhqd', p, split(v))
        ctx = ctx.transpose(0, 2, 1, 3).reshape(BATCH, SEQ, HIDDEN)
        x = _layer_norm(x + ctx @ params['wo'][l] + params['bo'][l],
                        params['ln1_g'][l], params['ln1_b'][l])
        h1 = _gelu_tanh(x @ params['wff1'][l] + params['bff1'][l])
        x = _layer_norm(x + h1 @ params['wff2'][l] + params['bff2'][l],
                        params['ln2_g'][l], params['ln2_b'][l])

    pooled = jnp.tanh(x[:, 0, :] @ params['w_pool'] + params['b_pool'])
    return pooled @ params['w_cls'] + params['b_cls']


# ---------------------------------------------------------------------------
# Parameter init (synthetic weights; pretrained bert-base weights not loadable here)
# ---------------------------------------------------------------------------
def init_params(key):
    ks = jax.random.split(key, 16)

    def w(k, shape, scale=0.1):
        return scale * jax.random.normal(k, shape, dtype=jnp.float32)

    ones = lambda shape: jnp.ones(shape, jnp.float32)
    zeros = lambda shape: jnp.zeros(shape, jnp.float32)
    H, I, L = HIDDEN, INTERMEDIATE, NUM_LAYERS
    return dict(
        word_emb=w(ks[0], (VOCAB, H)),
        pos_emb=w(ks[1], (MAX_POS, H)),
        type_emb=w(ks[2], (1, H)),
        ln_e_g=ones((1, H)), ln_e_b=zeros((1, H)),
        wqkv=w(ks[3], (L, H, 3 * H)), bqkv=w(ks[4], (L, 1, 3 * H), 0.02),
        wo=w(ks[5], (L, H, H)), bo=w(ks[6], (L, 1, H), 0.02),
        ln1_g=ones((L, 1, H)), ln1_b=zeros((L, 1, H)),
        wff1=w(ks[7], (L, H, I)), bff1=w(ks[8], (L, 1, I), 0.02),
        wff2=w(ks[9], (L, I, H)), bff2=w(ks[10], (L, 1, H), 0.02),
        ln2_g=ones((L, 1, H)), ln2_b=zeros((L, 1, H)),
        w_pool=w(ks[11], (H, H)), b_pool=w(ks[12], (1, H), 0.02),
        w_cls=w(ks[13], (H, NUM_LABELS)), b_cls=w(ks[14], (1, NUM_LABELS), 0.02),
    )


if __name__ == "__main__":
    key = jax.random.PRNGKey(0)
    pkey, ikey = jax.random.split(key)
    params = init_params(pkey)

    input_ids = jax.random.randint(ikey, (BATCH, SEQ), 0, VOCAB, dtype=jnp.int32)
    attention_mask = jnp.array([[1, 1, 1, 1, 1, 1, 1, 1],
                                [1, 1, 1, 1, 1, 1, 0, 0]], dtype=jnp.float32)

    logits = jax.block_until_ready(
        bert_classifier_forward(params, input_ids, attention_mask))

    ref = bert_reference(params, input_ids, attention_mask)
    max_err = float(jnp.max(jnp.abs(logits - ref)))
    assert logits.shape == (BATCH, NUM_LABELS)
    assert bool(jnp.all(jnp.isfinite(logits))), "non-finite logits"
    assert max_err < 5e-2, f"kernel vs reference mismatch: max_err={max_err}"
    print("KERNEL_OK")
</pallas_src>

<mosaic_0001>
module attributes {stable_mosaic.version = 11 : i64} {
  func.func @_bert_kernel(%arg0: i32, %arg1: memref<8x1xi32, #tpu.memory_space<vmem>>, %arg2: memref<8x1xi32, #tpu.memory_space<vmem>>, %arg3: memref<1x1x8xf32, #tpu.memory_space<vmem>>, %arg4: memref<128x32xf32, #tpu.memory_space<vmem>>, %arg5: memref<16x32xf32, #tpu.memory_space<vmem>>, %arg6: memref<1x32xf32, #tpu.memory_space<vmem>>, %arg7: memref<1x32xf32, #tpu.memory_space<vmem>>, %arg8: memref<1x32xf32, #tpu.memory_space<vmem>>, %arg9: memref<2x32x96xf32, #tpu.memory_space<vmem>>, %arg10: memref<2x1x96xf32, #tpu.memory_space<vmem>>, %arg11: memref<2x32x32xf32, #tpu.memory_space<vmem>>, %arg12: memref<2x1x32xf32, #tpu.memory_space<vmem>>, %arg13: memref<2x1x32xf32, #tpu.memory_space<vmem>>, %arg14: memref<2x1x32xf32, #tpu.memory_space<vmem>>, %arg15: memref<2x32x64xf32, #tpu.memory_space<vmem>>, %arg16: memref<2x1x64xf32, #tpu.memory_space<vmem>>, %arg17: memref<2x64x32xf32, #tpu.memory_space<vmem>>, %arg18: memref<2x1x32xf32, #tpu.memory_space<vmem>>, %arg19: memref<2x1x32xf32, #tpu.memory_space<vmem>>, %arg20: memref<2x1x32xf32, #tpu.memory_space<vmem>>, %arg21: memref<32x32xf32, #tpu.memory_space<vmem>>, %arg22: memref<1x32xf32, #tpu.memory_space<vmem>>, %arg23: memref<32x128xf32, #tpu.memory_space<vmem>>, %arg24: memref<1x128xf32, #tpu.memory_space<vmem>>, %arg25: memref<1x1x128xf32, #tpu.memory_space<vmem>>) attributes {dimension_semantics = [#tpu.dimension_semantics<parallel>], iteration_bounds = array<i64: 2>, scalar_prefetch = 0 : i64, scratch_operands = 0 : i64, tpu.core_type = #tpu.core_type<tc>, window_params = [{transform_indices = @transform_0, window_bounds = array<i64: 8, 1>}, {pipeline_mode = #tpu.pipeline_mode<synchronous>, transform_indices = @transform_1, window_bounds = array<i64: 8, 1>}, {transform_indices = @transform_2, window_bounds = array<i64: 1, 1, 8>}, {pipeline_mode = #tpu.pipeline_mode<synchronous>, transform_indices = @transform_3, window_bounds = array<i64: 128, 32>}, {pipeline_mode = #tpu.pipeline_mode<synchronous>, transform_indices = @transform_4, window_bounds = array<i64: 16, 32>}, {pipeline_mode = #tpu.pipeline_mode<synchronous>, transform_indices = @transform_5, window_bounds = array<i64: 1, 32>}, {pipeline_mode = #tpu.pipeline_mode<synchronous>, transform_indices = @transform_6, window_bounds = array<i64: 1, 32>}, {pipeline_mode = #tpu.pipeline_mode<synchronous>, transform_indices = @transform_7, window_bounds = array<i64: 1, 32>}, {pipeline_mode = #tpu.pipeline_mode<synchronous>, transform_indices = @transform_8, window_bounds = array<i64: 2, 32, 96>}, {pipeline_mode = #tpu.pipeline_mode<synchronous>, transform_indices = @transform_9, window_bounds = array<i64: 2, 1, 96>}, {pipeline_mode = #tpu.pipeline_mode<synchronous>, transform_indices = @transform_10, window_bounds = array<i64: 2, 32, 32>}, {pipeline_mode = #tpu.pipeline_mode<synchronous>, transform_indices = @transform_11, window_bounds = array<i64: 2, 1, 32>}, {pipeline_mode = #tpu.pipeline_mode<synchronous>, transform_indices = @transform_12, window_bounds = array<i64: 2, 1, 32>}, {pipeline_mode = #tpu.pipeline_mode<synchronous>, transform_indices = @transform_13, window_bounds = array<i64: 2, 1, 32>}, {pipeline_mode = #tpu.pipeline_mode<synchronous>, transform_indices = @transform_14, window_bounds = array<i64: 2, 32, 64>}, {pipeline_mode = #tpu.pipeline_mode<synchronous>, transform_indices = @transform_15, window_bounds = array<i64: 2, 1, 64>}, {pipeline_mode = #tpu.pipeline_mode<synchronous>, transform_indices = @transform_16, window_bounds = array<i64: 2, 64, 32>}, {pipeline_mode = #tpu.pipeline_mode<synchronous>, transform_indices = @transform_17, window_bounds = array<i64: 2, 1, 32>}, {pipeline_mode = #tpu.pipeline_mode<synchronous>, transform_indices = @transform_18, window_bounds = array<i64: 2, 1, 32>}, {pipeline_mode = #tpu.pipeline_mode<synchronous>, transform_indices = @transform_19, window_bounds = array<i64: 2, 1, 32>}, {pipeline_mode = #tpu.pipeline_mode<synchronous>, transform_indices = @transform_20, window_bounds = array<i64: 32, 32>}, {pipeline_mode = #tpu.pipeline_mode<synchronous>, transform_indices = @transform_21, window_bounds = array<i64: 1, 32>}, {pipeline_mode = #tpu.pipeline_mode<synchronous>, transform_indices = @transform_22, window_bounds = array<i64: 32, 128>}, {pipeline_mode = #tpu.pipeline_mode<synchronous>, transform_indices = @transform_23, window_bounds = array<i64: 1, 128>}, {transform_indices = @transform_24, window_bounds = array<i64: 1, 1, 128>}]} {
    %c0 = arith.constant 0 : index
    %c0_0 = arith.constant 0 : index
    %0 = vector.load %arg1[%c0, %c0_0] : memref<8x1xi32, #tpu.memory_space<vmem>>, vector<8x1xi32>
    %1 = tpu.iota {dimensions = array<i32: 1>} : vector<8x128xi32>
    %2 = vector.broadcast %0 : vector<8x1xi32> to vector<8x128xi32>
    %3 = arith.cmpi eq, %2, %1 : vector<8x128xi32>
    %4 = arith.extui %3 : vector<8x128xi1> to vector<8x128xi32>
    %5 = arith.sitofp %4 : vector<8x128xi32> to vector<8x128xf32>
    %c0_1 = arith.constant 0 : index
    %c0_2 = arith.constant 0 : index
    %6 = vector.load %arg2[%c0_1, %c0_2] : memref<8x1xi32, #tpu.memory_space<vmem>>, vector<8x1xi32>
    %7 = tpu.iota {dimensions = array<i32: 1>} : vector<8x16xi32>
    %8 = vector.broadcast %6 : vector<8x1xi32> to vector<8x16xi32>
    %9 = arith.cmpi eq, %8, %7 : vector<8x16xi32>
    %10 = arith.extui %9 : vector<8x16xi1> to vector<8x16xi32>
    %11 = arith.sitofp %10 : vector<8x16xi32> to vector<8x16xf32>
    %c0_3 = arith.constant 0 : index
    %c0_4 = arith.constant 0 : index
    %12 = vector.load %arg4[%c0_3, %c0_4] : memref<128x32xf32, #tpu.memory_space<vmem>>, vector<128x32xf32>
    %cst = arith.constant dense<0.000000e+00> : vector<8x32xf32>
    %13 = tpu.matmul %5, %12, %cst {dimension_numbers = #tpu.dot_dimension_numbers<[1], [0], [0], [1], [0, 0, 1, 1], [], []>} : vector<8x128xf32>, vector<128x32xf32>, vector<8x32xf32> -> vector<8x32xf32>
    %c0_5 = arith.constant 0 : index
    %c0_6 = arith.constant 0 : index
    %14 = vector.load %arg5[%c0_5, %c0_6] : memref<16x32xf32, #tpu.memory_space<vmem>>, vector<16x32xf32>
    %cst_7 = arith.constant dense<0.000000e+00> : vector<8x32xf32>
    %15 = tpu.matmul %11, %14, %cst_7 {dimension_numbers = #tpu.dot_dimension_numbers<[1], [0], [0], [1], [0, 0, 1, 1], [], []>} : vector<8x16xf32>, vector<16x32xf32>, vector<8x32xf32> -> vector<8x32xf32>
    %16 = arith.addf %13, %15 : vector<8x32xf32>
    %c0_8 = arith.constant 0 : index
    %c0_9 = arith.constant 0 : index
    %17 = vector.load %arg6[%c0_8, %c0_9] : memref<1x32xf32, #tpu.memory_space<vmem>>, vector<1x32xf32>
    %18 = vector.broadcast %17 : vector<1x32xf32> to vector<8x32xf32>
    %19 = arith.addf %16, %18 : vector<8x32xf32>
    %c0_10 = arith.constant 0 : index
    %c0_11 = arith.constant 0 : index
    %20 = vector.load %arg7[%c0_10, %c0_11] : memref<1x32xf32, #tpu.memory_space<vmem>>, vector<1x32xf32>
    %c0_12 = arith.constant 0 : index
    %c0_13 = arith.constant 0 : index
    %21 = vector.load %arg8[%c0_12, %c0_13] : memref<1x32xf32, #tpu.memory_space<vmem>>, vector<1x32xf32>
    %cst_14 = arith.constant dense<0.000000e+00> : vector<8xf32>
    %22 = vector.multi_reduction <add>, %19, %cst_14 [1] : vector<8x32xf32> to vector<8xf32>
    %23 = vector.shape_cast %22 : vector<8xf32> to vector<8x1xf32>
    %cst_15 = arith.constant 3.200000e+01 : f32
    %24 = vector.broadcast %cst_15 : f32 to vector<8x1xf32>
    %25 = arith.divf %23, %24 : vector<8x1xf32>
    %26 = vector.broadcast %25 : vector<8x1xf32> to vector<8x32xf32>
    %27 = arith.subf %19, %26 : vector<8x32xf32>
    %28 = arith.mulf %27, %27 : vector<8x32xf32>
    %cst_16 = arith.constant dense<0.000000e+00> : vector<8xf32>
    %29 = vector.multi_reduction <add>, %28, %cst_16 [1] : vector<8x32xf32> to vector<8xf32>
    %30 = vector.shape_cast %29 : vector<8xf32> to vector<8x1xf32>
    %cst_17 = arith.constant 3.200000e+01 : f32
    %31 = vector.broadcast %cst_17 : f32 to vector<8x1xf32>
    %32 = arith.divf %30, %31 : vector<8x1xf32>
    %cst_18 = arith.constant 9.99999996E-13 : f32
    %33 = vector.broadcast %cst_18 : f32 to vector<8x1xf32>
    %34 = arith.addf %32, %33 : vector<8x1xf32>
    %35 = math.rsqrt %34 : vector<8x1xf32>
    %36 = vector.broadcast %35 : vector<8x1xf32> to vector<8x32xf32>
    %37 = arith.mulf %27, %36 : vector<8x32xf32>
    %38 = vector.broadcast %20 : vector<1x32xf32> to vector<8x32xf32>
    %39 = arith.mulf %37, %38 : vector<8x32xf32>
    %40 = vector.broadcast %21 : vector<1x32xf32> to vector<8x32xf32>
    %41 = arith.addf %39, %40 : vector<8x32xf32>
    %c0_19 = arith.constant 0 : index
    %c0_20 = arith.constant 0 : index
    %c0_21 = arith.constant 0 : index
    %42 = vector.load %arg3[%c0_19, %c0_20, %c0_21] : memref<1x1x8xf32, #tpu.memory_space<vmem>>, vector<1x1x8xf32>
    %cst_22 = arith.constant 1.000000e+00 : f32
    %43 = vector.broadcast %cst_22 : f32 to vector<1x1x8xf32>
    %44 = arith.subf %42, %43 : vector<1x1x8xf32>
    %cst_23 = arith.constant 1.000000e+09 : f32
    %45 = vector.broadcast %cst_23 : f32 to vector<1x1x8xf32>
    %46 = arith.mulf %44, %45 : vector<1x1x8xf32>
    %47 = arith.truncf %41 : vector<8x32xf32> to vector<8x32xbf16>
    %c0_24 = arith.constant 0 : index
    %c0_25 = arith.constant 0 : index
    %c0_26 = arith.constant 0 : index
    %48 = vector.load %arg9[%c0_24, %c0_25, %c0_26] : memref<2x32x96xf32, #tpu.memory_space<vmem>>, vector<1x32x96xf32>
    %49 = vector.shape_cast %48 : vector<1x32x96xf32> to vector<32x96xf32>
    %50 = arith.truncf %49 : vector<32x96xf32> to vector<32x96xbf16>
    %cst_27 = arith.constant dense<0.000000e+00> : vector<8x96xf32>
    %51 = tpu.matmul %47, %50, %cst_27 {dimension_numbers = #tpu.dot_dimension_numbers<[1], [0], [0], [1], [0, 0, 1, 1], [], []>} : vector<8x32xbf16>, vector<32x96xbf16>, vector<8x96xf32> -> vector<8x96xf32>
    %c0_28 = arith.constant 0 : index
    %c0_29 = arith.constant 0 : index
    %c0_30 = arith.constant 0 : index
    %52 = vector.load %arg10[%c0_28, %c0_29, %c0_30] : memref<2x1x96xf32, #tpu.memory_space<vmem>>, vector<1x1x96xf32>
    %53 = vector.shape_cast %52 : vector<1x1x96xf32> to vector<1x96xf32>
    %54 = vector.broadcast %53 : vector<1x96xf32> to vector<8x96xf32>
    %55 = arith.addf %51, %54 : vector<8x96xf32>
    %56 = vector.extract_strided_slice %55 {offsets = [0, 0], sizes = [8, 32], strides = [1, 1]} : vector<8x96xf32> to vector<8x32xf32>
    %cst_31 = arith.constant 0.353553385 : f32
    %57 = vector.broadcast %cst_31 : f32 to vector<8x32xf32>
    %58 = arith.mulf %56, %57 : vector<8x32xf32>
    %59 = vector.extract_strided_slice %55 {offsets = [0, 32], sizes = [8, 32], strides = [1, 1]} : vector<8x96xf32> to vector<8x32xf32>
    %60 = vector.extract_strided_slice %55 {offsets = [0, 64], sizes = [8, 32], strides = [1, 1]} : vector<8x96xf32> to vector<8x32xf32>
    %61 = vector.extract_strided_slice %58 {offsets = [0, 0], sizes = [8, 8], strides = [1, 1]} : vector<8x32xf32> to vector<8x8xf32>
    %62 = vector.extract_strided_slice %58 {offsets = [0, 8], sizes = [8, 8], strides = [1, 1]} : vector<8x32xf32> to vector<8x8xf32>
    %63 = vector.extract_strided_slice %58 {offsets = [0, 16], sizes = [8, 8], strides = [1, 1]} : vector<8x32xf32> to vector<8x8xf32>
    %64 = vector.extract_strided_slice %58 {offsets = [0, 24], sizes = [8, 8], strides = [1, 1]} : vector<8x32xf32> to vector<8x8xf32>
    %65 = vector.shape_cast %61 : vector<8x8xf32> to vector<1x8x8xf32>
    %66 = vector.shape_cast %62 : vector<8x8xf32> to vector<1x8x8xf32>
    %67 = vector.shape_cast %63 : vector<8x8xf32> to vector<1x8x8xf32>
    %68 = vector.shape_cast %64 : vector<8x8xf32> to vector<1x8x8xf32>
    %69 = tpu.concatenate %65, %66, %67, %68 in 0 : vector<1x8x8xf32>, vector<1x8x8xf32>, vector<1x8x8xf32>, vector<1x8x8xf32> -> vector<4x8x8xf32>
    %70 = vector.extract_strided_slice %59 {offsets = [0, 0], sizes = [8, 8], strides = [1, 1]} : vector<8x32xf32> to vector<8x8xf32>
    %71 = vector.extract_strided_slice %59 {offsets = [0, 8], sizes = [8, 8], strides = [1, 1]} : vector<8x32xf32> to vector<8x8xf32>
    %72 = vector.extract_strided_slice %59 {offsets = [0, 16], sizes = [8, 8], strides = [1, 1]} : vector<8x32xf32> to vector<8x8xf32>
    %73 = vector.extract_strided_slice %59 {offsets = [0, 24], sizes = [8, 8], strides = [1, 1]} : vector<8x32xf32> to vector<8x8xf32>
    %74 = vector.shape_cast %70 : vector<8x8xf32> to vector<1x8x8xf32>
    %75 = vector.shape_cast %71 : vector<8x8xf32> to vector<1x8x8xf32>
    %76 = vector.shape_cast %72 : vector<8x8xf32> to vector<1x8x8xf32>
    %77 = vector.shape_cast %73 : vector<8x8xf32> to vector<1x8x8xf32>
    %78 = tpu.concatenate %74, %75, %76, %77 in 0 : vector<1x8x8xf32>, vector<1x8x8xf32>, vector<1x8x8xf32>, vector<1x8x8xf32> -> vector<4x8x8xf32>
    %79 = vector.extract_strided_slice %60 {offsets = [0, 0], sizes = [8, 8], strides = [1, 1]} : vector<8x32xf32> to vector<8x8xf32>
    %80 = vector.extract_strided_slice %60 {offsets = [0, 8], sizes = [8, 8], strides = [1, 1]} : vector<8x32xf32> to vector<8x8xf32>
    %81 = vector.extract_strided_slice %60 {offsets = [0, 16], sizes = [8, 8], strides = [1, 1]} : vector<8x32xf32> to vector<8x8xf32>
    %82 = vector.extract_strided_slice %60 {offsets = [0, 24], sizes = [8, 8], strides = [1, 1]} : vector<8x32xf32> to vector<8x8xf32>
    %83 = vector.shape_cast %79 : vector<8x8xf32> to vector<1x8x8xf32>
    %84 = vector.shape_cast %80 : vector<8x8xf32> to vector<1x8x8xf32>
    %85 = vector.shape_cast %81 : vector<8x8xf32> to vector<1x8x8xf32>
    %86 = vector.shape_cast %82 : vector<8x8xf32> to vector<1x8x8xf32>
    %87 = tpu.concatenate %83, %84, %85, %86 in 0 : vector<1x8x8xf32>, vector<1x8x8xf32>, vector<1x8x8xf32>, vector<1x8x8xf32> -> vector<4x8x8xf32>
    %88 = arith.truncf %69 : vector<4x8x8xf32> to vector<4x8x8xbf16>
    %89 = arith.truncf %78 : vector<4x8x8xf32> to vector<4x8x8xbf16>
    "tpu.trace_start"() <{level = 10 : i32, message = "hqd,hkd->hqk"}> : () -> ()
    %cst_32 = arith.constant dense<0.000000e+00> : vector<4x8x8xf32>
    %90 = tpu.matmul %88, %89, %cst_32 {dimension_numbers = #tpu.dot_dimension_numbers<[2], [2], [1], [1], [0, 0, 0, 1, 1, 1], [0], [0]>} : vector<4x8x8xbf16>, vector<4x8x8xbf16>, vector<4x8x8xf32> -> vector<4x8x8xf32>
    "tpu.trace_stop"() : () -> ()
    %91 = vector.broadcast %46 : vector<1x1x8xf32> to vector<4x8x8xf32>
    %92 = arith.addf %90, %91 : vector<4x8x8xf32>
    %cst_33 = arith.constant dense<0xFF800000> : vector<4x8xf32>
    %93 = vector.multi_reduction <maximumf>, %92, %cst_33 [2] : vector<4x8x8xf32> to vector<4x8xf32>
    %94 = vector.shape_cast %93 : vector<4x8xf32> to vector<4x8x1xf32>
    %95 = vector.broadcast %94 : vector<4x8x1xf32> to vector<4x8x8xf32>
    %96 = arith.subf %92, %95 : vector<4x8x8xf32>
    %97 = math.exp %96 : vector<4x8x8xf32>
    %cst_34 = arith.constant dense<0.000000e+00> : vector<4x8xf32>
    %98 = vector.multi_reduction <add>, %97, %cst_34 [2] : vector<4x8x8xf32> to vector<4x8xf32>
    %99 = vector.shape_cast %98 : vector<4x8xf32> to vector<4x8x1xf32>
    %100 = tpu.reciprocal %99 {approx = true} : vector<4x8x1xf32> -> vector<4x8x1xf32>
    %101 = vector.broadcast %100 : vector<4x8x1xf32> to vector<4x8x8xf32>
    %102 = arith.mulf %97, %101 : vector<4x8x8xf32>
    %103 = arith.truncf %102 : vector<4x8x8xf32> to vector<4x8x8xbf16>
    %104 = arith.truncf %87 : vector<4x8x8xf32> to vector<4x8x8xbf16>
    "tpu.trace_start"() <{level = 10 : i32, message = "hqk,hkd->hqd"}> : () -> ()
    %cst_35 = arith.constant dense<0.000000e+00> : vector<4x8x8xf32>
    %105 = tpu.matmul %103, %104, %cst_35 {dimension_numbers = #tpu.dot_dimension_numbers<[2], [1], [1], [2], [0, 0, 0, 1, 1, 2], [0], [0]>} : vector<4x8x8xbf16>, vector<4x8x8xbf16>, vector<4x8x8xf32> -> vector<4x8x8xf32>
    "tpu.trace_stop"() : () -> ()
    %106 = vector.extract_strided_slice %105 {offsets = [0, 0, 0], sizes = [1, 8, 8], strides = [1, 1, 1]} : vector<4x8x8xf32> to vector<1x8x8xf32>
    %107 = vector.shape_cast %106 : vector<1x8x8xf32> to vector<8x8xf32>
    %108 = vector.extract_strided_slice %105 {offsets = [1, 0, 0], sizes = [1, 8, 8], strides = [1, 1, 1]} : vector<4x8x8xf32> to vector<1x8x8xf32>
    %109 = vector.shape_cast %108 : vector<1x8x8xf32> to vector<8x8xf32>
    %110 = vector.extract_strided_slice %105 {offsets = [2, 0, 0], sizes = [1, 8, 8], strides = [1, 1, 1]} : vector<4x8x8xf32> to vector<1x8x8xf32>
    %111 = vector.shape_cast %110 : vector<1x8x8xf32> to vector<8x8xf32>
    %112 = vector.extract_strided_slice %105 {offsets = [3, 0, 0], sizes = [1, 8, 8], strides = [1, 1, 1]} : vector<4x8x8xf32> to vector<1x8x8xf32>
    %113 = vector.shape_cast %112 : vector<1x8x8xf32> to vector<8x8xf32>
    %114 = tpu.concatenate %107, %109, %111, %113 in 1 : vector<8x8xf32>, vector<8x8xf32>, vector<8x8xf32>, vector<8x8xf32> -> vector<8x32xf32>
    %115 = arith.truncf %114 : vector<8x32xf32> to vector<8x32xbf16>
    %c0_36 = arith.constant 0 : index
    %c0_37 = arith.constant 0 : index
    %c0_38 = arith.constant 0 : index
    %116 = vector.load %arg11[%c0_36, %c0_37, %c0_38] : memref<2x32x32xf32, #tpu.memory_space<vmem>>, vector<1x32x32xf32>
    %117 = vector.shape_cast %116 : vector<1x32x32xf32> to vector<32x32xf32>
    %118 = arith.truncf %117 : vector<32x32xf32> to vector<32x32xbf16>
    %cst_39 = arith.constant dense<0.000000e+00> : vector<8x32xf32>
    %119 = tpu.matmul %115, %118, %cst_39 {dimension_numbers = #tpu.dot_dimension_numbers<[1], [0], [0], [1], [0, 0, 1, 1], [], []>} : vector<8x32xbf16>, vector<32x32xbf16>, vector<8x32xf32> -> vector<8x32xf32>
    %c0_40 = arith.constant 0 : index
    %c0_41 = arith.constant 0 : index
    %c0_42 = arith.constant 0 : index
    %120 = vector.load %arg12[%c0_40, %c0_41, %c0_42] : memref<2x1x32xf32, #tpu.memory_space<vmem>>, vector<1x1x32xf32>
    %121 = vector.shape_cast %120 : vector<1x1x32xf32> to vector<1x32xf32>
    %122 = vector.broadcast %121 : vector<1x32xf32> to vector<8x32xf32>
    %123 = arith.addf %119, %122 : vector<8x32xf32>
    %124 = arith.addf %41, %123 : vector<8x32xf32>
    %c0_43 = arith.constant 0 : index
    %c0_44 = arith.constant 0 : index
    %c0_45 = arith.constant 0 : index
    %125 = vector.load %arg13[%c0_43, %c0_44, %c0_45] : memref<2x1x32xf32, #tpu.memory_space<vmem>>, vector<1x1x32xf32>
    %126 = vector.shape_cast %125 : vector<1x1x32xf32> to vector<1x32xf32>
    %c0_46 = arith.constant 0 : index
    %c0_47 = arith.constant 0 : index
    %c0_48 = arith.constant 0 : index
    %127 = vector.load %arg14[%c0_46, %c0_47, %c0_48] : memref<2x1x32xf32, #tpu.memory_space<vmem>>, vector<1x1x32xf32>
    %128 = vector.shape_cast %127 : vector<1x1x32xf32> to vector<1x32xf32>
    %cst_49 = arith.constant dense<0.000000e+00> : vector<8xf32>
    %129 = vector.multi_reduction <add>, %124, %cst_49 [1] : vector<8x32xf32> to vector<8xf32>
    %130 = vector.shape_cast %129 : vector<8xf32> to vector<8x1xf32>
    %cst_50 = arith.constant 3.200000e+01 : f32
    %131 = vector.broadcast %cst_50 : f32 to vector<8x1xf32>
    %132 = arith.divf %130, %131 : vector<8x1xf32>
    %133 = vector.broadcast %132 : vector<8x1xf32> to vector<8x32xf32>
    %134 = arith.subf %124, %133 : vector<8x32xf32>
    %135 = arith.mulf %134, %134 : vector<8x32xf32>
    %cst_51 = arith.constant dense<0.000000e+00> : vector<8xf32>
    %136 = vector.multi_reduction <add>, %135, %cst_51 [1] : vector<8x32xf32> to vector<8xf32>
    %137 = vector.shape_cast %136 : vector<8xf32> to vector<8x1xf32>
    %cst_52 = arith.constant 3.200000e+01 : f32
    %138 = vector.broadcast %cst_52 : f32 to vector<8x1xf32>
    %139 = arith.divf %137, %138 : vector<8x1xf32>
    %cst_53 = arith.constant 9.99999996E-13 : f32
    %140 = vector.broadcast %cst_53 : f32 to vector<8x1xf32>
    %141 = arith.addf %139, %140 : vector<8x1xf32>
    %142 = math.rsqrt %141 : vector<8x1xf32>
    %143 = vector.broadcast %142 : vector<8x1xf32> to vector<8x32xf32>
    %144 = arith.mulf %134, %143 : vector<8x32xf32>
    %145 = vector.broadcast %126 : vector<1x32xf32> to vector<8x32xf32>
    %146 = arith.mulf %144, %145 : vector<8x32xf32>
    %147 = vector.broadcast %128 : vector<1x32xf32> to vector<8x32xf32>
    %148 = arith.addf %146, %147 : vector<8x32xf32>
    %149 = arith.truncf %148 : vector<8x32xf32> to vector<8x32xbf16>
    %c0_54 = arith.constant 0 : index
    %c0_55 = arith.constant 0 : index
    %c0_56 = arith.constant 0 : index
    %150 = vector.load %arg15[%c0_54, %c0_55, %c0_56] : memref<2x32x64xf32, #tpu.memory_space<vmem>>, vector<1x32x64xf32>
    %151 = vector.shape_cast %150 : vector<1x32x64xf32> to vector<32x64xf32>
    %152 = arith.truncf %151 : vector<32x64xf32> to vector<32x64xbf16>
    %cst_57 = arith.constant dense<0.000000e+00> : vector<8x64xf32>
    %153 = tpu.matmul %149, %152, %cst_57 {dimension_numbers = #tpu.dot_dimension_numbers<[1], [0], [0], [1], [0, 0, 1, 1], [], []>} : vector<8x32xbf16>, vector<32x64xbf16>, vector<8x64xf32> -> vector<8x64xf32>
    %c0_58 = arith.constant 0 : index
    %c0_59 = arith.constant 0 : index
    %c0_60 = arith.constant 0 : index
    %154 = vector.load %arg16[%c0_58, %c0_59, %c0_60] : memref<2x1x64xf32, #tpu.memory_space<vmem>>, vector<1x1x64xf32>
    %155 = vector.shape_cast %154 : vector<1x1x64xf32> to vector<1x64xf32>
    %156 = vector.broadcast %155 : vector<1x64xf32> to vector<8x64xf32>
    %157 = arith.addf %153, %156 : vector<8x64xf32>
    %cst_61 = arith.constant 5.000000e-01 : f32
    %158 = vector.broadcast %cst_61 : f32 to vector<8x64xf32>
    %159 = arith.mulf %158, %157 : vector<8x64xf32>
    %cst_62 = arith.constant 4.471500e-02 : f32
    %160 = vector.broadcast %cst_62 : f32 to vector<8x64xf32>
    %161 = arith.mulf %160, %157 : vector<8x64xf32>
    %162 = arith.mulf %161, %157 : vector<8x64xf32>
    %163 = arith.mulf %162, %157 : vector<8x64xf32>
    %164 = arith.addf %157, %163 : vector<8x64xf32>
    %cst_63 = arith.constant 0.797884583 : f32
    %165 = vector.broadcast %cst_63 : f32 to vector<8x64xf32>
    %166 = arith.mulf %165, %164 : vector<8x64xf32>
    %167 = math.tanh %166 : vector<8x64xf32>
    %cst_64 = arith.constant 1.000000e+00 : f32
    %168 = vector.broadcast %cst_64 : f32 to vector<8x64xf32>
    %169 = arith.addf %168, %167 : vector<8x64xf32>
    %170 = arith.mulf %159, %169 : vector<8x64xf32>
    %171 = arith.truncf %170 : vector<8x64xf32> to vector<8x64xbf16>
    %c0_65 = arith.constant 0 : index
    %c0_66 = arith.constant 0 : index
    %c0_67 = arith.constant 0 : index
    %172 = vector.load %arg17[%c0_65, %c0_66, %c0_67] : memref<2x64x32xf32, #tpu.memory_space<vmem>>, vector<1x64x32xf32>
    %173 = vector.shape_cast %172 : vector<1x64x32xf32> to vector<64x32xf32>
    %174 = arith.truncf %173 : vector<64x32xf32> to vector<64x32xbf16>
    %cst_68 = arith.constant dense<0.000000e+00> : vector<8x32xf32>
    %175 = tpu.matmul %171, %174, %cst_68 {dimension_numbers = #tpu.dot_dimension_numbers<[1], [0], [0], [1], [0, 0, 1, 1], [], []>} : vector<8x64xbf16>, vector<64x32xbf16>, vector<8x32xf32> -> vector<8x32xf32>
    %c0_69 = arith.constant 0 : index
    %c0_70 = arith.constant 0 : index
    %c0_71 = arith.constant 0 : index
    %176 = vector.load %arg18[%c0_69, %c0_70, %c0_71] : memref<2x1x32xf32, #tpu.memory_space<vmem>>, vector<1x1x32xf32>
    %177 = vector.shape_cast %176 : vector<1x1x32xf32> to vector<1x32xf32>
    %178 = vector.broadcast %177 : vector<1x32xf32> to vector<8x32xf32>
    %179 = arith.addf %175, %178 : vector<8x32xf32>
    %180 = arith.addf %148, %179 : vector<8x32xf32>
    %c0_72 = arith.constant 0 : index
    %c0_73 = arith.constant 0 : index
    %c0_74 = arith.constant 0 : index
    %181 = vector.load %arg19[%c0_72, %c0_73, %c0_74] : memref<2x1x32xf32, #tpu.memory_space<vmem>>, vector<1x1x32xf32>
    %182 = vector.shape_cast %181 : vector<1x1x32xf32> to vector<1x32xf32>
    %c0_75 = arith.constant 0 : index
    %c0_76 = arith.constant 0 : index
    %c0_77 = arith.constant 0 : index
    %183 = vector.load %arg20[%c0_75, %c0_76, %c0_77] : memref<2x1x32xf32, #tpu.memory_space<vmem>>, vector<1x1x32xf32>
    %184 = vector.shape_cast %183 : vector<1x1x32xf32> to vector<1x32xf32>
    %cst_78 = arith.constant dense<0.000000e+00> : vector<8xf32>
    %185 = vector.multi_reduction <add>, %180, %cst_78 [1] : vector<8x32xf32> to vector<8xf32>
    %186 = vector.shape_cast %185 : vector<8xf32> to vector<8x1xf32>
    %cst_79 = arith.constant 3.200000e+01 : f32
    %187 = vector.broadcast %cst_79 : f32 to vector<8x1xf32>
    %188 = arith.divf %186, %187 : vector<8x1xf32>
    %189 = vector.broadcast %188 : vector<8x1xf32> to vector<8x32xf32>
    %190 = arith.subf %180, %189 : vector<8x32xf32>
    %191 = arith.mulf %190, %190 : vector<8x32xf32>
    %cst_80 = arith.constant dense<0.000000e+00> : vector<8xf32>
    %192 = vector.multi_reduction <add>, %191, %cst_80 [1] : vector<8x32xf32> to vector<8xf32>
    %193 = vector.shape_cast %192 : vector<8xf32> to vector<8x1xf32>
    %cst_81 = arith.constant 3.200000e+01 : f32
    %194 = vector.broadcast %cst_81 : f32 to vector<8x1xf32>
    %195 = arith.divf %193, %194 : vector<8x1xf32>
    %cst_82 = arith.constant 9.99999996E-13 : f32
    %196 = vector.broadcast %cst_82 : f32 to vector<8x1xf32>
    %197 = arith.addf %195, %196 : vector<8x1xf32>
    %198 = math.rsqrt %197 : vector<8x1xf32>
    %199 = vector.broadcast %198 : vector<8x1xf32> to vector<8x32xf32>
    %200 = arith.mulf %190, %199 : vector<8x32xf32>
    %201 = vector.broadcast %182 : vector<1x32xf32> to vector<8x32xf32>
    %202 = arith.mulf %200, %201 : vector<8x32xf32>
    %203 = vector.broadcast %184 : vector<1x32xf32> to vector<8x32xf32>
    %204 = arith.addf %202, %203 : vector<8x32xf32>
    %205 = arith.truncf %204 : vector<8x32xf32> to vector<8x32xbf16>
    %c1 = arith.constant 1 : index
    %c0_83 = arith.constant 0 : index
    %c0_84 = arith.constant 0 : index
    %206 = vector.load %arg9[%c1, %c0_83, %c0_84] : memref<2x32x96xf32, #tpu.memory_space<vmem>>, vector<1x32x96xf32>
    %207 = vector.shape_cast %206 : vector<1x32x96xf32> to vector<32x96xf32>
    %208 = arith.truncf %207 : vector<32x96xf32> to vector<32x96xbf16>
    %cst_85 = arith.constant dense<0.000000e+00> : vector<8x96xf32>
    %209 = tpu.matmul %205, %208, %cst_85 {dimension_numbers = #tpu.dot_dimension_numbers<[1], [0], [0], [1], [0, 0, 1, 1], [], []>} : vector<8x32xbf16>, vector<32x96xbf16>, vector<8x96xf32> -> vector<8x96xf32>
    %c1_86 = arith.constant 1 : index
    %c0_87 = arith.constant 0 : index
    %c0_88 = arith.constant 0 : index
    %210 = vector.load %arg10[%c1_86, %c0_87, %c0_88] : memref<2x1x96xf32, #tpu.memory_space<vmem>>, vector<1x1x96xf32>
    %211 = vector.shape_cast %210 : vector<1x1x96xf32> to vector<1x96xf32>
    %212 = vector.broadcast %211 : vector<1x96xf32> to vector<8x96xf32>
    %213 = arith.addf %209, %212 : vector<8x96xf32>
    %214 = vector.extract_strided_slice %213 {offsets = [0, 0], sizes = [8, 32], strides = [1, 1]} : vector<8x96xf32> to vector<8x32xf32>
    %cst_89 = arith.constant 0.353553385 : f32
    %215 = vector.broadcast %cst_89 : f32 to vector<8x32xf32>
    %216 = arith.mulf %214, %215 : vector<8x32xf32>
    %217 = vector.extract_strided_slice %213 {offsets = [0, 32], sizes = [8, 32], strides = [1, 1]} : vector<8x96xf32> to vector<8x32xf32>
    %218 = vector.extract_strided_slice %213 {offsets = [0, 64], sizes = [8, 32], strides = [1, 1]} : vector<8x96xf32> to vector<8x32xf32>
    %219 = vector.extract_strided_slice %216 {offsets = [0, 0], sizes = [8, 8], strides = [1, 1]} : vector<8x32xf32> to vector<8x8xf32>
    %220 = vector.extract_strided_slice %216 {offsets = [0, 8], sizes = [8, 8], strides = [1, 1]} : vector<8x32xf32> to vector<8x8xf32>
    %221 = vector.extract_strided_slice %216 {offsets = [0, 16], sizes = [8, 8], strides = [1, 1]} : vector<8x32xf32> to vector<8x8xf32>
    %222 = vector.extract_strided_slice %216 {offsets = [0, 24], sizes = [8, 8], strides = [1, 1]} : vector<8x32xf32> to vector<8x8xf32>
    %223 = vector.shape_cast %219 : vector<8x8xf32> to vector<1x8x8xf32>
    %224 = vector.shape_cast %220 : vector<8x8xf32> to vector<1x8x8xf32>
    %225 = vector.shape_cast %221 : vector<8x8xf32> to vector<1x8x8xf32>
    %226 = vector.shape_cast %222 : vector<8x8xf32> to vector<1x8x8xf32>
    %227 = tpu.concatenate %223, %224, %225, %226 in 0 : vector<1x8x8xf32>, vector<1x8x8xf32>, vector<1x8x8xf32>, vector<1x8x8xf32> -> vector<4x8x8xf32>
    %228 = vector.extract_strided_slice %217 {offsets = [0, 0], sizes = [8, 8], strides = [1, 1]} : vector<8x32xf32> to vector<8x8xf32>
    %229 = vector.extract_strided_slice %217 {offsets = [0, 8], sizes = [8, 8], strides = [1, 1]} : vector<8x32xf32> to vector<8x8xf32>
    %230 = vector.extract_strided_slice %217 {offsets = [0, 16], sizes = [8, 8], strides = [1, 1]} : vector<8x32xf32> to vector<8x8xf32>
    %231 = vector.extract_strided_slice %217 {offsets = [0, 24], sizes = [8, 8], strides = [1, 1]} : vector<8x32xf32> to vector<8x8xf32>
    %232 = vector.shape_cast %228 : vector<8x8xf32> to vector<1x8x8xf32>
    %233 = vector.shape_cast %229 : vector<8x8xf32> to vector<1x8x8xf32>
    %234 = vector.shape_cast %230 : vector<8x8xf32> to vector<1x8x8xf32>
    %235 = vector.shape_cast %231 : vector<8x8xf32> to vector<1x8x8xf32>
    %236 = tpu.concatenate %232, %233, %234, %235 in 0 : vector<1x8x8xf32>, vector<1x8x8xf32>, vector<1x8x8xf32>, vector<1x8x8xf32> -> vector<4x8x8xf32>
    %237 = vector.extract_strided_slice %218 {offsets = [0, 0], sizes = [8, 8], strides = [1, 1]} : vector<8x32xf32> to vector<8x8xf32>
    %238 = vector.extract_strided_slice %218 {offsets = [0, 8], sizes = [8, 8], strides = [1, 1]} : vector<8x32xf32> to vector<8x8xf32>
    %239 = vector.extract_strided_slice %218 {offsets = [0, 16], sizes = [8, 8], strides = [1, 1]} : vector<8x32xf32> to vector<8x8xf32>
    %240 = vector.extract_strided_slice %218 {offsets = [0, 24], sizes = [8, 8], strides = [1, 1]} : vector<8x32xf32> to vector<8x8xf32>
    %241 = vector.shape_cast %237 : vector<8x8xf32> to vector<1x8x8xf32>
    %242 = vector.shape_cast %238 : vector<8x8xf32> to vector<1x8x8xf32>
    %243 = vector.shape_cast %239 : vector<8x8xf32> to vector<1x8x8xf32>
    %244 = vector.shape_cast %240 : vector<8x8xf32> to vector<1x8x8xf32>
    %245 = tpu.concatenate %241, %242, %243, %244 in 0 : vector<1x8x8xf32>, vector<1x8x8xf32>, vector<1x8x8xf32>, vector<1x8x8xf32> -> vector<4x8x8xf32>
    %246 = arith.truncf %227 : vector<4x8x8xf32> to vector<4x8x8xbf16>
    %247 = arith.truncf %236 : vector<4x8x8xf32> to vector<4x8x8xbf16>
    "tpu.trace_start"() <{level = 10 : i32, message = "hqd,hkd->hqk"}> : () -> ()
    %cst_90 = arith.constant dense<0.000000e+00> : vector<4x8x8xf32>
    %248 = tpu.matmul %246, %247, %cst_90 {dimension_numbers = #tpu.dot_dimension_numbers<[2], [2], [1], [1], [0, 0, 0, 1, 1, 1], [0], [0]>} : vector<4x8x8xbf16>, vector<4x8x8xbf16>, vector<4x8x8xf32> -> vector<4x8x8xf32>
    "tpu.trace_stop"() : () -> ()
    %249 = vector.broadcast %46 : vector<1x1x8xf32> to vector<4x8x8xf32>
    %250 = arith.addf %248, %249 : vector<4x8x8xf32>
    %cst_91 = arith.constant dense<0xFF800000> : vector<4x8xf32>
    %251 = vector.multi_reduction <maximumf>, %250, %cst_91 [2] : vector<4x8x8xf32> to vector<4x8xf32>
    %252 = vector.shape_cast %251 : vector<4x8xf32> to vector<4x8x1xf32>
    %253 = vector.broadcast %252 : vector<4x8x1xf32> to vector<4x8x8xf32>
    %254 = arith.subf %250, %253 : vector<4x8x8xf32>
    %255 = math.exp %254 : vector<4x8x8xf32>
    %cst_92 = arith.constant dense<0.000000e+00> : vector<4x8xf32>
    %256 = vector.multi_reduction <add>, %255, %cst_92 [2] : vector<4x8x8xf32> to vector<4x8xf32>
    %257 = vector.shape_cast %256 : vector<4x8xf32> to vector<4x8x1xf32>
    %258 = tpu.reciprocal %257 {approx = true} : vector<4x8x1xf32> -> vector<4x8x1xf32>
    %259 = vector.broadcast %258 : vector<4x8x1xf32> to vector<4x8x8xf32>
    %260 = arith.mulf %255, %259 : vector<4x8x8xf32>
    %261 = arith.truncf %260 : vector<4x8x8xf32> to vector<4x8x8xbf16>
    %262 = arith.truncf %245 : vector<4x8x8xf32> to vector<4x8x8xbf16>
    "tpu.trace_start"() <{level = 10 : i32, message = "hqk,hkd->hqd"}> : () -> ()
    %cst_93 = arith.constant dense<0.000000e+00> : vector<4x8x8xf32>
    %263 = tpu.matmul %261, %262, %cst_93 {dimension_numbers = #tpu.dot_dimension_numbers<[2], [1], [1], [2], [0, 0, 0, 1, 1, 2], [0], [0]>} : vector<4x8x8xbf16>, vector<4x8x8xbf16>, vector<4x8x8xf32> -> vector<4x8x8xf32>
    "tpu.trace_stop"() : () -> ()
    %264 = vector.extract_strided_slice %263 {offsets = [0, 0, 0], sizes = [1, 8, 8], strides = [1, 1, 1]} : vector<4x8x8xf32> to vector<1x8x8xf32>
    %265 = vector.shape_cast %264 : vector<1x8x8xf32> to vector<8x8xf32>
    %266 = vector.extract_strided_slice %263 {offsets = [1, 0, 0], sizes = [1, 8, 8], strides = [1, 1, 1]} : vector<4x8x8xf32> to vector<1x8x8xf32>
    %267 = vector.shape_cast %266 : vector<1x8x8xf32> to vector<8x8xf32>
    %268 = vector.extract_strided_slice %263 {offsets = [2, 0, 0], sizes = [1, 8, 8], strides = [1, 1, 1]} : vector<4x8x8xf32> to vector<1x8x8xf32>
    %269 = vector.shape_cast %268 : vector<1x8x8xf32> to vector<8x8xf32>
    %270 = vector.extract_strided_slice %263 {offsets = [3, 0, 0], sizes = [1, 8, 8], strides = [1, 1, 1]} : vector<4x8x8xf32> to vector<1x8x8xf32>
    %271 = vector.shape_cast %270 : vector<1x8x8xf32> to vector<8x8xf32>
    %272 = tpu.concatenate %265, %267, %269, %271 in 1 : vector<8x8xf32>, vector<8x8xf32>, vector<8x8xf32>, vector<8x8xf32> -> vector<8x32xf32>
    %273 = arith.truncf %272 : vector<8x32xf32> to vector<8x32xbf16>
    %c1_94 = arith.constant 1 : index
    %c0_95 = arith.constant 0 : index
    %c0_96 = arith.constant 0 : index
    %274 = vector.load %arg11[%c1_94, %c0_95, %c0_96] : memref<2x32x32xf32, #tpu.memory_space<vmem>>, vector<1x32x32xf32>
    %275 = vector.shape_cast %274 : vector<1x32x32xf32> to vector<32x32xf32>
    %276 = arith.truncf %275 : vector<32x32xf32> to vector<32x32xbf16>
    %cst_97 = arith.constant dense<0.000000e+00> : vector<8x32xf32>
    %277 = tpu.matmul %273, %276, %cst_97 {dimension_numbers = #tpu.dot_dimension_numbers<[1], [0], [0], [1], [0, 0, 1, 1], [], []>} : vector<8x32xbf16>, vector<32x32xbf16>, vector<8x32xf32> -> vector<8x32xf32>
    %c1_98 = arith.constant 1 : index
    %c0_99 = arith.constant 0 : index
    %c0_100 = arith.constant 0 : index
    %278 = vector.load %arg12[%c1_98, %c0_99, %c0_100] : memref<2x1x32xf32, #tpu.memory_space<vmem>>, vector<1x1x32xf32>
    %279 = vector.shape_cast %278 : vector<1x1x32xf32> to vector<1x32xf32>
    %280 = vector.broadcast %279 : vector<1x32xf32> to vector<8x32xf32>
    %281 = arith.addf %277, %280 : vector<8x32xf32>
    %282 = arith.addf %204, %281 : vector<8x32xf32>
    %c1_101 = arith.constant 1 : index
    %c0_102 = arith.constant 0 : index
    %c0_103 = arith.constant 0 : index
    %283 = vector.load %arg13[%c1_101, %c0_102, %c0_103] : memref<2x1x32xf32, #tpu.memory_space<vmem>>, vector<1x1x32xf32>
    %284 = vector.shape_cast %283 : vector<1x1x32xf32> to vector<1x32xf32>
    %c1_104 = arith.constant 1 : index
    %c0_105 = arith.constant 0 : index
    %c0_106 = arith.constant 0 : index
    %285 = vector.load %arg14[%c1_104, %c0_105, %c0_106] : memref<2x1x32xf32, #tpu.memory_space<vmem>>, vector<1x1x32xf32>
    %286 = vector.shape_cast %285 : vector<1x1x32xf32> to vector<1x32xf32>
    %cst_107 = arith.constant dense<0.000000e+00> : vector<8xf32>
    %287 = vector.multi_reduction <add>, %282, %cst_107 [1] : vector<8x32xf32> to vector<8xf32>
    %288 = vector.shape_cast %287 : vector<8xf32> to vector<8x1xf32>
    %cst_108 = arith.constant 3.200000e+01 : f32
    %289 = vector.broadcast %cst_108 : f32 to vector<8x1xf32>
    %290 = arith.divf %288, %289 : vector<8x1xf32>
    %291 = vector.broadcast %290 : vector<8x1xf32> to vector<8x32xf32>
    %292 = arith.subf %282, %291 : vector<8x32xf32>
    %293 = arith.mulf %292, %292 : vector<8x32xf32>
    %cst_109 = arith.constant dense<0.000000e+00> : vector<8xf32>
    %294 = vector.multi_reduction <add>, %293, %cst_109 [1] : vector<8x32xf32> to vector<8xf32>
    %295 = vector.shape_cast %294 : vector<8xf32> to vector<8x1xf32>
    %cst_110 = arith.constant 3.200000e+01 : f32
    %296 = vector.broadcast %cst_110 : f32 to vector<8x1xf32>
    %297 = arith.divf %295, %296 : vector<8x1xf32>
    %cst_111 = arith.constant 9.99999996E-13 : f32
    %298 = vector.broadcast %cst_111 : f32 to vector<8x1xf32>
    %299 = arith.addf %297, %298 : vector<8x1xf32>
    %300 = math.rsqrt %299 : vector<8x1xf32>
    %301 = vector.broadcast %300 : vector<8x1xf32> to vector<8x32xf32>
    %302 = arith.mulf %292, %301 : vector<8x32xf32>
    %303 = vector.broadcast %284 : vector<1x32xf32> to vector<8x32xf32>
    %304 = arith.mulf %302, %303 : vector<8x32xf32>
    %305 = vector.broadcast %286 : vector<1x32xf32> to vector<8x32xf32>
    %306 = arith.addf %304, %305 : vector<8x32xf32>
    %307 = arith.truncf %306 : vector<8x32xf32> to vector<8x32xbf16>
    %c1_112 = arith.constant 1 : index
    %c0_113 = arith.constant 0 : index
    %c0_114 = arith.constant 0 : index
    %308 = vector.load %arg15[%c1_112, %c0_113, %c0_114] : memref<2x32x64xf32, #tpu.memory_space<vmem>>, vector<1x32x64xf32>
    %309 = vector.shape_cast %308 : vector<1x32x64xf32> to vector<32x64xf32>
    %310 = arith.truncf %309 : vector<32x64xf32> to vector<32x64xbf16>
    %cst_115 = arith.constant dense<0.000000e+00> : vector<8x64xf32>
    %311 = tpu.matmul %307, %310, %cst_115 {dimension_numbers = #tpu.dot_dimension_numbers<[1], [0], [0], [1], [0, 0, 1, 1], [], []>} : vector<8x32xbf16>, vector<32x64xbf16>, vector<8x64xf32> -> vector<8x64xf32>
    %c1_116 = arith.constant 1 : index
    %c0_117 = arith.constant 0 : index
    %c0_118 = arith.constant 0 : index
    %312 = vector.load %arg16[%c1_116, %c0_117, %c0_118] : memref<2x1x64xf32, #tpu.memory_space<vmem>>, vector<1x1x64xf32>
    %313 = vector.shape_cast %312 : vector<1x1x64xf32> to vector<1x64xf32>
    %314 = vector.broadcast %313 : vector<1x64xf32> to vector<8x64xf32>
    %315 = arith.addf %311, %314 : vector<8x64xf32>
    %cst_119 = arith.constant 5.000000e-01 : f32
    %316 = vector.broadcast %cst_119 : f32 to vector<8x64xf32>
    %317 = arith.mulf %316, %315 : vector<8x64xf32>
    %cst_120 = arith.constant 4.471500e-02 : f32
    %318 = vector.broadcast %cst_120 : f32 to vector<8x64xf32>
    %319 = arith.mulf %318, %315 : vector<8x64xf32>
    %320 = arith.mulf %319, %315 : vector<8x64xf32>
    %321 = arith.mulf %320, %315 : vector<8x64xf32>
    %322 = arith.addf %315, %321 : vector<8x64xf32>
    %cst_121 = arith.constant 0.797884583 : f32
    %323 = vector.broadcast %cst_121 : f32 to vector<8x64xf32>
    %324 = arith.mulf %323, %322 : vector<8x64xf32>
    %325 = math.tanh %324 : vector<8x64xf32>
    %cst_122 = arith.constant 1.000000e+00 : f32
    %326 = vector.broadcast %cst_122 : f32 to vector<8x64xf32>
    %327 = arith.addf %326, %325 : vector<8x64xf32>
    %328 = arith.mulf %317, %327 : vector<8x64xf32>
    %329 = arith.truncf %328 : vector<8x64xf32> to vector<8x64xbf16>
    %c1_123 = arith.constant 1 : index
    %c0_124 = arith.constant 0 : index
    %c0_125 = arith.constant 0 : index
    %330 = vector.load %arg17[%c1_123, %c0_124, %c0_125] : memref<2x64x32xf32, #tpu.memory_space<vmem>>, vector<1x64x32xf32>
    %331 = vector.shape_cast %330 : vector<1x64x32xf32> to vector<64x32xf32>
    %332 = arith.truncf %331 : vector<64x32xf32> to vector<64x32xbf16>
    %cst_126 = arith.constant dense<0.000000e+00> : vector<8x32xf32>
    %333 = tpu.matmul %329, %332, %cst_126 {dimension_numbers = #tpu.dot_dimension_numbers<[1], [0], [0], [1], [0, 0, 1, 1], [], []>} : vector<8x64xbf16>, vector<64x32xbf16>, vector<8x32xf32> -> vector<8x32xf32>
    %c1_127 = arith.constant 1 : index
    %c0_128 = arith.constant 0 : index
    %c0_129 = arith.constant 0 : index
    %334 = vector.load %arg18[%c1_127, %c0_128, %c0_129] : memref<2x1x32xf32, #tpu.memory_space<vmem>>, vector<1x1x32xf32>
    %335 = vector.shape_cast %334 : vector<1x1x32xf32> to vector<1x32xf32>
    %336 = vector.broadcast %335 : vector<1x32xf32> to vector<8x32xf32>
    %337 = arith.addf %333, %336 : vector<8x32xf32>
    %338 = arith.addf %306, %337 : vector<8x32xf32>
    %c1_130 = arith.constant 1 : index
    %c0_131 = arith.constant 0 : index
    %c0_132 = arith.constant 0 : index
    %339 = vector.load %arg19[%c1_130, %c0_131, %c0_132] : memref<2x1x32xf32, #tpu.memory_space<vmem>>, vector<1x1x32xf32>
    %340 = vector.shape_cast %339 : vector<1x1x32xf32> to vector<1x32xf32>
    %c1_133 = arith.constant 1 : index
    %c0_134 = arith.constant 0 : index
    %c0_135 = arith.constant 0 : index
    %341 = vector.load %arg20[%c1_133, %c0_134, %c0_135] : memref<2x1x32xf32, #tpu.memory_space<vmem>>, vector<1x1x32xf32>
    %342 = vector.shape_cast %341 : vector<1x1x32xf32> to vector<1x32xf32>
    %cst_136 = arith.constant dense<0.000000e+00> : vector<8xf32>
    %343 = vector.multi_reduction <add>, %338, %cst_136 [1] : vector<8x32xf32> to vector<8xf32>
    %344 = vector.shape_cast %343 : vector<8xf32> to vector<8x1xf32>
    %cst_137 = arith.constant 3.200000e+01 : f32
    %345 = vector.broadcast %cst_137 : f32 to vector<8x1xf32>
    %346 = arith.divf %344, %345 : vector<8x1xf32>
    %347 = vector.broadcast %346 : vector<8x1xf32> to vector<8x32xf32>
    %348 = arith.subf %338, %347 : vector<8x32xf32>
    %349 = arith.mulf %348, %348 : vector<8x32xf32>
    %cst_138 = arith.constant dense<0.000000e+00> : vector<8xf32>
    %350 = vector.multi_reduction <add>, %349, %cst_138 [1] : vector<8x32xf32> to vector<8xf32>
    %351 = vector.shape_cast %350 : vector<8xf32> to vector<8x1xf32>
    %cst_139 = arith.constant 3.200000e+01 : f32
    %352 = vector.broadcast %cst_139 : f32 to vector<8x1xf32>
    %353 = arith.divf %351, %352 : vector<8x1xf32>
    %cst_140 = arith.constant 9.99999996E-13 : f32
    %354 = vector.broadcast %cst_140 : f32 to vector<8x1xf32>
    %355 = arith.addf %353, %354 : vector<8x1xf32>
    %356 = math.rsqrt %355 : vector<8x1xf32>
    %357 = vector.broadcast %356 : vector<8x1xf32> to vector<8x32xf32>
    %358 = arith.mulf %348, %357 : vector<8x32xf32>
    %359 = vector.broadcast %340 : vector<1x32xf32> to vector<8x32xf32>
    %360 = arith.mulf %358, %359 : vector<8x32xf32>
    %361 = vector.broadcast %342 : vector<1x32xf32> to vector<8x32xf32>
    %362 = arith.addf %360, %361 : vector<8x32xf32>
    %363 = vector.extract_strided_slice %362 {offsets = [0, 0], sizes = [1, 32], strides = [1, 1]} : vector<8x32xf32> to vector<1x32xf32>
    %364 = arith.truncf %363 : vector<1x32xf32> to vector<1x32xbf16>
    %c0_141 = arith.constant 0 : index
    %c0_142 = arith.constant 0 : index
    %365 = vector.load %arg21[%c0_141, %c0_142] : memref<32x32xf32, #tpu.memory_space<vmem>>, vector<32x32xf32>
    %366 = arith.truncf %365 : vector<32x32xf32> to vector<32x32xbf16>
    %cst_143 = arith.constant dense<0.000000e+00> : vector<1x32xf32>
    %367 = tpu.matmul %364, %366, %cst_143 {dimension_numbers = #tpu.dot_dimension_numbers<[1], [0], [0], [1], [0, 0, 1, 1], [], []>} : vector<1x32xbf16>, vector<32x32xbf16>, vector<1x32xf32> -> vector<1x32xf32>
    %c0_144 = arith.constant 0 : index
    %c0_145 = arith.constant 0 : index
    %368 = vector.load %arg22[%c0_144, %c0_145] : memref<1x32xf32, #tpu.memory_space<vmem>>, vector<1x32xf32>
    %369 = arith.addf %367, %368 : vector<1x32xf32>
    %370 = math.tanh %369 : vector<1x32xf32>
    %371 = arith.truncf %370 : vector<1x32xf32> to vector<1x32xbf16>
    %c0_146 = arith.constant 0 : index
    %c0_147 = arith.constant 0 : index
    %372 = vector.load %arg23[%c0_146, %c0_147] : memref<32x128xf32, #tpu.memory_space<vmem>>, vector<32x128xf32>
    %373 = arith.truncf %372 : vector<32x128xf32> to vector<32x128xbf16>
    %cst_148 = arith.constant dense<0.000000e+00> : vector<1x128xf32>
    %374 = tpu.matmul %371, %373, %cst_148 {dimension_numbers = #tpu.dot_dimension_numbers<[1], [0], [0], [1], [0, 0, 1, 1], [], []>} : vector<1x32xbf16>, vector<32x128xbf16>, vector<1x128xf32> -> vector<1x128xf32>
    %c0_149 = arith.constant 0 : index
    %c0_150 = arith.constant 0 : index
    %375 = vector.load %arg24[%c0_149, %c0_150] : memref<1x128xf32, #tpu.memory_space<vmem>>, vector<1x128xf32>
    %376 = arith.addf %374, %375 : vector<1x128xf32>
    %377 = vector.shape_cast %376 : vector<1x128xf32> to vector<1x1x128xf32>
    %c0_151 = arith.constant 0 : index
    %c0_152 = arith.constant 0 : index
    %c0_153 = arith.constant 0 : index
    %378 = vector.load %arg25[%c0_151, %c0_152, %c0_153] : memref<1x1x128xf32, #tpu.memory_space<vmem>>, vector<1x1x128xf32>
    tpu.vector_store %arg25[%c0_151, %c0_152, %c0_153], %377 {strides = array<i32>} : memref<1x1x128xf32, #tpu.memory_space<vmem>>, vector<1x1x128xf32>,
    return
  }
  func.func @transform_0(%arg0: i32) -> (i32, i32) {
    %c0_i32 = arith.constant 0 : i32
    %c0_i32_0 = arith.constant 0 : i32
    return %arg0, %c0_i32 : i32, i32
  }
  func.func @transform_1(%arg0: i32) -> (i32, i32) {
    %c0_i32 = arith.constant 0 : i32
    %c0_i32_0 = arith.constant 0 : i32
    %c0_i32_1 = arith.constant 0 : i32
    return %c0_i32, %c0_i32_0 : i32, i32
  }
  func.func @transform_2(%arg0: i32) -> (i32, i32, i32) {
    %c0_i32 = arith.constant 0 : i32
    %c0_i32_0 = arith.constant 0 : i32
    %c0_i32_1 = arith.constant 0 : i32
    return %arg0, %c0_i32, %c0_i32_0 : i32, i32, i32
  }
  func.func @transform_3(%arg0: i32) -> (i32, i32) {
    %c0_i32 = arith.constant 0 : i32
    %c0_i32_0 = arith.constant 0 : i32
    %c0_i32_1 = arith.constant 0 : i32
    return %c0_i32, %c0_i32_0 : i32, i32
  }
  func.func @transform_4(%arg0: i32) -> (i32, i32) {
    %c0_i32 = arith.constant 0 : i32
    %c0_i32_0 = arith.constant 0 : i32
    %c0_i32_1 = arith.constant 0 : i32
    return %c0_i32, %c0_i32_0 : i32, i32
  }
  func.func @transform_5(%arg0: i32) -> (i32, i32) {
    %c0_i32 = arith.constant 0 : i32
    %c0_i32_0 = arith.constant 0 : i32
    %c0_i32_1 = arith.constant 0 : i32
    return %c0_i32, %c0_i32_0 : i32, i32
  }
  func.func @transform_6(%arg0: i32) -> (i32, i32) {
    %c0_i32 = arith.constant 0 : i32
    %c0_i32_0 = arith.constant 0 : i32
    %c0_i32_1 = arith.constant 0 : i32
    return %c0_i32, %c0_i32_0 : i32, i32
  }
  func.func @transform_7(%arg0: i32) -> (i32, i32) {
    %c0_i32 = arith.constant 0 : i32
    %c0_i32_0 = arith.constant 0 : i32
    %c0_i32_1 = arith.constant 0 : i32
    return %c0_i32, %c0_i32_0 : i32, i32
  }
  func.func @transform_8(%arg0: i32) -> (i32, i32, i32) {
    %c0_i32 = arith.constant 0 : i32
    %c0_i32_0 = arith.constant 0 : i32
    %c0_i32_1 = arith.constant 0 : i32
    %c0_i32_2 = arith.constant 0 : i32
    return %c0_i32, %c0_i32_0, %c0_i32_1 : i32, i32, i32
  }
  func.func @transform_9(%arg0: i32) -> (i32, i32, i32) {
    %c0_i32 = arith.constant 0 : i32
    %c0_i32_0 = arith.constant 0 : i32
    %c0_i32_1 = arith.constant 0 : i32
    %c0_i32_2 = arith.constant 0 : i32
    return %c0_i32, %c0_i32_0, %c0_i32_1 : i32, i32, i32
  }
  func.func @transform_10(%arg0: i32) -> (i32, i32, i32) {
    %c0_i32 = arith.constant 0 : i32
    %c0_i32_0 = arith.constant 0 : i32
    %c0_i32_1 = arith.constant 0 : i32
    %c0_i32_2 = arith.constant 0 : i32
    return %c0_i32, %c0_i32_0, %c0_i32_1 : i32, i32, i32
  }
  func.func @transform_11(%arg0: i32) -> (i32, i32, i32) {
    %c0_i32 = arith.constant 0 : i32
    %c0_i32_0 = arith.constant 0 : i32
    %c0_i32_1 = arith.constant 0 : i32
    %c0_i32_2 = arith.constant 0 : i32
    return %c0_i32, %c0_i32_0, %c0_i32_1 : i32, i32, i32
  }
  func.func @transform_12(%arg0: i32) -> (i32, i32, i32) {
    %c0_i32 = arith.constant 0 : i32
    %c0_i32_0 = arith.constant 0 : i32
    %c0_i32_1 = arith.constant 0 : i32
    %c0_i32_2 = arith.constant 0 : i32
    return %c0_i32, %c0_i32_0, %c0_i32_1 : i32, i32, i32
  }
  func.func @transform_13(%arg0: i32) -> (i32, i32, i32) {
    %c0_i32 = arith.constant 0 : i32
    %c0_i32_0 = arith.constant 0 : i32
    %c0_i32_1 = arith.constant 0 : i32
    %c0_i32_2 = arith.constant 0 : i32
    return %c0_i32, %c0_i32_0, %c0_i32_1 : i32, i32, i32
  }
  func.func @transform_14(%arg0: i32) -> (i32, i32, i32) {
    %c0_i32 = arith.constant 0 : i32
    %c0_i32_0 = arith.constant 0 : i32
    %c0_i32_1 = arith.constant 0 : i32
    %c0_i32_2 = arith.constant 0 : i32
    return %c0_i32, %c0_i32_0, %c0_i32_1 : i32, i32, i32
  }
  func.func @transform_15(%arg0: i32) -> (i32, i32, i32) {
    %c0_i32 = arith.constant 0 : i32
    %c0_i32_0 = arith.constant 0 : i32
    %c0_i32_1 = arith.constant 0 : i32
    %c0_i32_2 = arith.constant 0 : i32
    return %c0_i32, %c0_i32_0, %c0_i32_1 : i32, i32, i32
  }
  func.func @transform_16(%arg0: i32) -> (i32, i32, i32) {
    %c0_i32 = arith.constant 0 : i32
    %c0_i32_0 = arith.constant 0 : i32
    %c0_i32_1 = arith.constant 0 : i32
    %c0_i32_2 = arith.constant 0 : i32
    return %c0_i32, %c0_i32_0, %c0_i32_1 : i32, i32, i32
  }
  func.func @transform_17(%arg0: i32) -> (i32, i32, i32) {
    %c0_i32 = arith.constant 0 : i32
    %c0_i32_0 = arith.constant 0 : i32
    %c0_i32_1 = arith.constant 0 : i32
    %c0_i32_2 = arith.constant 0 : i32
    return %c0_i32, %c0_i32_0, %c0_i32_1 : i32, i32, i32
  }
  func.func @transform_18(%arg0: i32) -> (i32, i32, i32) {
    %c0_i32 = arith.constant 0 : i32
    %c0_i32_0 = arith.constant 0 : i32
    %c0_i32_1 = arith.constant 0 : i32
    %c0_i32_2 = arith.constant 0 : i32
    return %c0_i32, %c0_i32_0, %c0_i32_1 : i32, i32, i32
  }
  func.func @transform_19(%arg0: i32) -> (i32, i32, i32) {
    %c0_i32 = arith.constant 0 : i32
    %c0_i32_0 = arith.constant 0 : i32
    %c0_i32_1 = arith.constant 0 : i32
    %c0_i32_2 = arith.constant 0 : i32
    return %c0_i32, %c0_i32_0, %c0_i32_1 : i32, i32, i32
  }
  func.func @transform_20(%arg0: i32) -> (i32, i32) {
    %c0_i32 = arith.constant 0 : i32
    %c0_i32_0 = arith.constant 0 : i32
    %c0_i32_1 = arith.constant 0 : i32
    return %c0_i32, %c0_i32_0 : i32, i32
  }
  func.func @transform_21(%arg0: i32) -> (i32, i32) {
    %c0_i32 = arith.constant 0 : i32
    %c0_i32_0 = arith.constant 0 : i32
    %c0_i32_1 = arith.constant 0 : i32
    return %c0_i32, %c0_i32_0 : i32, i32
  }
  func.func @transform_22(%arg0: i32) -> (i32, i32) {
    %c0_i32 = arith.constant 0 : i32
    %c0_i32_0 = arith.constant 0 : i32
    %c0_i32_1 = arith.constant 0 : i32
    return %c0_i32, %c0_i32_0 : i32, i32
  }
  func.func @transform_23(%arg0: i32) -> (i32, i32) {
    %c0_i32 = arith.constant 0 : i32
    %c0_i32_0 = arith.constant 0 : i32
    %c0_i32_1 = arith.constant 0 : i32
    return %c0_i32, %c0_i32_0 : i32, i32
  }
  func.func @transform_24(%arg0: i32) -> (i32, i32, i32) {
    %c0_i32 = arith.constant 0 : i32
    %c0_i32_0 = arith.constant 0 : i32
    %c0_i32_1 = arith.constant 0 : i32
    return %arg0, %c0_i32, %c0_i32_0 : i32, i32, i32
  }
}

</mosaic_0001>

<bundles_post_ra>
// kernel: bert_classifier_forward.1
= control target key start
LH: loop header
LB: loop body
LE: loop exit
PB: predicated region body
PF: predicated region fallthrough
CT: control target
= control target key end

     0   :  { %s4090_s0 = inlined_call_operand.vmem [shape: s32[16,1], index: 0, kind: input, shape index: {}]   ;;  %s4091_s1 = inlined_call_operand.vmem [shape: s32[8,1], index: 1, kind: input, shape index: {}]   ;;  %s4092_s2 = inlined_call_operand.vmem [shape: f32[2,1,8], index: 2, kind: input, shape index: {}]   ;;  %s4093_s3 = inlined_call_operand.vmem [shape: f32[128,32], index: 3, kind: input, shape index: {}]   ;;  %s4094_s4 = inlined_call_operand.vmem [shape: f32[16,32], index: 4, kind: input, shape index: {}]   ;;  %s4095_s5 = inlined_call_operand.vmem [shape: f32[1,32], index: 5, kind: input, shape index: {}]   ;;  %s4096_s6 = inlined_call_operand.vmem [shape: f32[1,32], index: 6, kind: input, shape index: {}]   ;;  %s4097_s7 = inlined_call_operand.vmem [shape: f32[1,32], index: 7, kind: input, shape index: {}]   ;;  %s4098_s8 = inlined_call_operand.vmem [shape: f32[2,32,96], index: 8, kind: input, shape index: {}]   ;;  %s4099_s9 = inlined_call_operand.vmem [shape: f32[2,1,96], index: 9, kind: input, shape index: {}]   ;;  %s4100_s10 = inlined_call_operand.vmem [shape: f32[2,32,32], index: 10, kind: input, shape index: {}]   ;;  %s4101_s11 = inlined_call_operand.vmem [shape: f32[2,1,32], index: 11, kind: input, shape index: {}]   ;;  %s4102_s12 = inlined_call_operand.vmem [shape: f32[2,1,32], index: 12, kind: input, shape index: {}]   ;;  %s4103_s13 = inlined_call_operand.vmem [shape: f32[2,1,32], index: 13, kind: input, shape index: {}]   ;;  %s4104_s14 = inlined_call_operand.vmem [shape: f32[2,32,64], index: 14, kind: input, shape index: {}]   ;;  %s4105_s15 = inlined_call_operand.vmem [shape: f32[2,1,64], index: 15, kind: input, shape index: {}]   ;;  %s4106_s16 = inlined_call_operand.vmem [shape: f32[2,64,32], index: 16, kind: input, shape index: {}]   ;;  %s4107_s17 = inlined_call_operand.vmem [shape: f32[2,1,32], index: 17, kind: input, shape index: {}]   ;;  %s4108_s18 = inlined_call_operand.vmem [shape: f32[2,1,32], index: 18, kind: input, shape index: {}]   ;;  %s4109_s19 = inlined_call_operand.vmem [shape: f32[2,1,32], index: 19, kind: input, shape index: {}]   ;;  %s4110_s20 = inlined_call_operand.vmem [shape: f32[32,32], index: 20, kind: input, shape index: {}]   ;;  %s4111_s21 = inlined_call_operand.vmem [shape: f32[1,32], index: 21, kind: input, shape index: {}]   ;;  %s4112_s22 = inlined_call_operand.vmem [shape: f32[32,128], index: 22, kind: input, shape index: {}]   ;;  %s4113_s23 = inlined_call_operand.vmem [shape: f32[1,128], index: 23, kind: input, shape index: {}]   ;;  %s4114_s24 = inlined_call_operand.hbm [shape: f32[2,1,128], index: 24, kind: output, shape index: {}]  }
   0x1   :  { %4131 = sst [smem:[#allocation13_spill]] %s4090_s0 }
   0x2   :  { %4132 = sst [smem:[#allocation14_spill]] %s4091_s1 }
   0x3   :  { %4133 = sst [smem:[#allocation15_spill]] %s4092_s2 }
   0x4   :  { %4134 = sst [smem:[#allocation16_spill]] %s4093_s3 }
   0x5   :  { %4135 = sst [smem:[#allocation17_spill]] %s4094_s4 }
   0x6   :  { %4136 = sst [smem:[#allocation18_spill]] %s4095_s5 }
   0x7   :  { %4137 = sst [smem:[#allocation19_spill]] %s4096_s6 }
   0x8   :  { %4138 = sst [smem:[#allocation20_spill]] %s4097_s7 }
   0x9   :  { %4139 = sst [smem:[#allocation21_spill]] %s4098_s8 }
   0xa   :  { %4140 = sst [smem:[#allocation22_spill]] %s4111_s21 }
   0xb   :  { %4141 = sst [smem:[#allocation23_spill]] %s4113_s23 }
   0xc   :  { %4142 = sst [smem:[#allocation24_spill]] %s4114_s24 }
   0xd   :  { %29 = vsyncpa [#allocation3], 0 }
   0xe   :  { %31 = vsyncpa [#allocation3 + $0x1], 0  ;;  %s3465_s5 = smov 0   ;;  %s3467_s26 = smov 0  }
   0xf   :  { %s3469_s27 = smov 0   ;;  %s3471_s28 = smov 0  }
  0x10 LB: > { %4143 = sst [smem:[#allocation5_spill]] %s3312_s5  ;;  %s3486_s6 = sadd.s32 4294967295, %s3324_s28   ;;  %s3324_s28 = sphi %s3471_s28, %s4174_s28   ;;  %s3320_s27 = sphi %s3469_s27, %s4176_s27   ;;  %s3316_s26 = sphi %s3467_s26, %s4178_s26   ;;  %s3312_s5 = sphi %s3465_s5, %s4177_s5  }
  0x11   : > { %4144 = sst [smem:[#allocation6_spill]] %s3320_s27  ;;  %s2736_s2 = sadd.s32 4294967294, %s3324_s28  }
  0x12   : > { %4145 = sst [smem:[#allocation7_spill]] %s3324_s28  ;;  %s3490_s29 = sadd.s32 1, %s3324_s28  }
  0x13   : > { %4146 = sst [smem:[#allocation8_spill]] %s3486_s6  ;;  %s558_s0 = sadd.s32 1, %s3320_s27 }
  0x14   : > { %4147 = sst [smem:[#allocation9_spill]] %s3490_s29  ;;  %s555_s7 = ssub.s32 %s3324_s28, %s3490_s29 }
  0x15   : > { %p568_p0 = scmp.ne.s32.totalorder %s3320_s27, %s3316_s26  ;;  %p556_p1 = scmp.eq.s32.totalorder %s555_s7, 0 }
  0x16   : > { %p569_p2 = scmp.eq.s32.totalorder %s3486_s6, 1  ;;  %p574_p3 = scmp.ne.s32.totalorder %s3316_s26, %s3312_s5 }
  0x17   : > { %p575_p4 = scmp.eq.s32.totalorder %s2736_s2, 1  ;;  %p2739_p7 = scmp.ge.s32.totalorder %s3324_s28, 1 }
  0x18   : > { %s3501_s30 = scalar_select %p556_p1, %s3320_s27, %s558_s0  }
  0x19   : > { %p3503_p5 = por %p569_p2, %p568_p0  ;;  %p3507_p6 = por %p575_p4, %p574_p3 }
  0x1a   : > { %4148 = sst [smem:[#allocation10_spill]] %s3501_s30  ;;  %p672_p8 = scmp.lt.s32.totalorder %s3324_s28, 3 }
  0x1b   : > { %s4149_s3 = scalar_select %p3503_p5, 1, 0 }
  0x1c   : > { %s4151_s25 = scalar_select %p3507_p6, 1, 0 }
  0x1d   : > { %4150 = sst [smem:[#allocation11_spill]] %s4149_s3  ;;  %p673_p9 = pnand %p2739_p7, %p672_p8 }
  0x1e   : > { %4152 = sst [smem:[#allocation12_spill]] %s4151_s25  ;;  %s4153_s1 = sld [smem:[#allocation14_spill]] (!%p673_p9)  ;;  %v3326_v3 = vmov (!%p673_p9), 0   ;;  %v3327_v4 = vmov (!%p673_p9), 0.0|0.0   ;;  %v748_v8 = vlaneseq (!%p673_p9)  ;;  %vm3328_vm0 = vmmov (!%p673_p9), 0  }
  0x1f   : > { %676 = sbr.rel (%p673_p9) target bundleno = 6410 (0x190a), region = 116  ;;  %p739_p10 = scmp.lt.s32.totalorder (!%p673_p9), %s3486_s6, 1  ;;  %3213 = vset.pattern.permute.xlu0 (!%p673_p9), %v3326_v3  ;;  %3137 = vmatprep.subr.bf16.mxu1 (!%p673_p9), %v3327_v4  ;;  %v3329_v12 = vmov (!%p673_p9), 0.0   ;;  %vm781_vm1 = vcmask (!%p673_p9), 130048   ;;  %v3330_v43 = vmov (!%p673_p9), 1.0   ;;  %vm935_vm4 = vcmask (!%p673_p9), 261120  }
  0x20   : > { %s4154_s7 = sld [smem:[#allocation16_spill]] (!%p673_p9)  ;;  %3134 = vmatprep.subr.bf16.mxu0 (!%p673_p9), %v3327_v4  ;;  %v1055_v11 = vshrl.u32 (!%p673_p9), %v748_v8, 7  ;;  %2912 = vmatprep.mubr.msk.f32.mxu0 (!%p673_p9), %vm3328_vm0, %v3329_v12  ;;  %s4155_s0 = sld [smem:[#allocation15_spill]] (!%p673_p9)  ;;  %v749_v39 = vand.u32 (!%p673_p9), 127, %v748_v8  ;;  %vm1062_vm5 = vcmask (!%p673_p9), 64512   ;;  %vm1309_vm6 = vcmask (!%p673_p9), 1043456  }
  0x21   : > { %s4156_s27 = sld [smem:[#allocation17_spill]] (!%p673_p9)  ;;  %2947 = vmatprep.mubr.msk.f32.mxu1 (!%p673_p9), %vm3328_vm0, %v3329_v12  ;;  %s4158_s25 = sld [smem:[#allocation13_spill]] (!%p673_p9)  ;;  %vm1511_vm7 = vcmask (!%p673_p9), 195584   ;;  %vm1686_vm8 = vcmask (!%p673_p9), 523264  }
  0x22   : > { %v1056_v20 = vsub.s32 (!%p673_p9), 0, %v1055_v11  ;;  %s4161_s21 = sld [smem:[#allocation19_spill]] (!%p673_p9)  ;;  %s3331_s4 = smov (!%p673_p9), 112  }
  0x23   : > { %s3335_s24 = smov (!%p673_p9), 64   ;;  %s4129_s23 = smov (!%p673_p9), 16  }
  0x24   : > { %v756_v0 = vld [vmem:[%s4153_s1] sm:$0xff] (!%p673_p9)  ;;  %s4128_s5 = smov (!%p673_p9), 24   ;;  %s4164_s28 = smov (!%p673_p9), 16  }
  0x25   : > { %758 = vperm.xlu0 (!%p673_p9), %3213, %v756_v0   ;;  %s4167_s3 = sld [smem:[#allocation22_spill]] (!%p673_p9) }
  0x26   : > { %v763_v1 = vld [vmem:[%s4154_s7] sm:$0xff]  ;;  %v764_v2 = vld [vmem:[%s4154_s7 + $0x8] sm:$0xff]  ;;  %v765_v6 = vld [vmem:[%s4154_s7 + $0x10] sm:$0xff]  ;;  %s740_s1 = scalar_select %p739_p10, %s3486_s6, 1 }
  0x27   : > { %v3138_v5 = vpack.c.bf16 %v764_v2, %v763_v1  ;;  %v766_v7 = vld [vmem:[%s4154_s7 + $0x18] sm:$0xff]  ;;  %v767_v10 = vld [vmem:[%s4154_s7 + $0x20] sm:$0xff]  ;;  %v768_v13 = vld [vmem:[%s4154_s7 + $0x28] sm:$0xff]  ;;  %s4157_s30 = smov %s4156_s27 }
  0x28   : > { %v3141_v9 = vpack.c.bf16 %v766_v7, %v765_v6  ;;  %s2740_s29 = sshll.u32 %s740_s1, 3  ;;  %s745_s8 = scalar_lea.vmem %s4155_s0, %s740_s1  ;;  %v779_v14 = vld [vmem:[%s4156_s27] sm:$0xff]  ;;  %v780_v15 = vld [vmem:[%s4157_s30 + $0x8] sm:$0xff]  ;;  %v3144_v21 = vpack.c.bf16 %v768_v13, %v767_v10  ;;  %v769_v23 = vld [vmem:[%s4154_s7 + $0x30] sm:$0xff] }
  0x29   : > { %3139 = vmatpush3.bf16.msra.mxu1 %v3138_v5  ;;  %s742_s1 = scalar_lea.vmem %s4158_s25, %s2740_s29  ;;  %v964_v16 = vld [vmem:[%s745_s8] sm:$0x1]  ;;  %v3135_v17 = vpack.c.bf16 %v780_v15, %v779_v14  ;;  %v770_v24 = vld [vmem:[%s4154_s7 + $0x38] sm:$0xff]  ;;  %v772_v28 = vld [vmem:[%s4154_s7 + $0x48] sm:$0xff]  ;;  %s4159_s29 = sld [smem:[#allocation18_spill]] }
  0x2a   : > { %3140 = vmatprep.subr.bf16.mxu1 %v3327_v4  ;;  %v747_v18 = vld [vmem:[%s742_s1] sm:$0xff]  ;;  %v2748_v19 = vadd.f32 -1.0, %v964_v16  ;;  %v3147_v26 = vpack.c.bf16 %v770_v24, %v769_v23  ;;  %v773_v30 = vld [vmem:[%s4154_s7 + $0x50] sm:$0xff]  ;;  %v774_v31 = vld [vmem:[%s4154_s7 + $0x58] sm:$0xff]  ;;  %s4160_s8 = sld [smem:[#allocation21_spill]]  ;;  %s3332_s27 = smov 120  }
  0x2b   : > { %751 = vperm.xlu0 %3213, %v747_v18   ;;  %3136 = vmatpush3.bf16.msra.mxu0 %v3135_v17  ;;  %v771_v27 = vld [vmem:[%s4154_s7 + $0x40] sm:$0xff]  ;;  %v3153_v32 = vpack.c.bf16 %v774_v31, %v773_v30  ;;  %v776_v34 = vld [vmem:[%s4154_s7 + $0x68] sm:$0xff]  ;;  %v777_v36 = vld [vmem:[%s4154_s7 + $0x70] sm:$0xff]  ;;  %s3333_s25 = smov 104   ;;  %s3334_s1 = smov 96  }
  0x2c   : > { %v966_v22 = vmul.f32 1e+09, %v2748_v19  ;;  %2950 = vmatprep.subr.bf16.mxu0 %v3329_v12  ;;  %v3150_v29 = vpack.c.bf16 %v772_v28, %v771_v27  ;;  %v775_v33 = vld [vmem:[%s4154_s7 + $0x60] sm:$0xff]  ;;  %v778_v37 = vld [vmem:[%s4154_s7 + $0x78] sm:$0xff]  ;;  %s4130_s0 = smov 8  }
  0x2d   : > { %3142 = vmatpush3.bf16.msra.mxu1 %v3141_v9  ;;  %v3156_v35 = vpack.c.bf16 %v776_v34, %v775_v33  ;;  %v3159_v38 = vpack.c.bf16 %v778_v37, %v777_v36  ;;  %v2746_v3 = vld [vmem:[%s4161_s21] ss:$0 sm:$0xff]  ;;  %s4165_s21 = smov 24  }
  0x2e   : > { %3143 = vmatprep.subr.bf16.mxu1 %v3327_v4  ;;  %v3559_v25 = vrot.slane %v966_v22, %v1056_v20  ;;  %v2749_v9 = vld [vmem:[%s4099_s9] ss:$0 sm:$0xff] }
  0x2f   : > { %v2745_v47 = vld [vmem:[%s4159_s29] ss:$0 sm:$0xff]  ;;  %s4162_s29 = sld [smem:[#allocation20_spill]] }
  0x30   : > { %v968_v57 = vld [vmem:[%s4160_s8] sm:$0xff]  ;;  %v969_v58 = vld [vmem:[%s4160_s8 + $0x8] sm:$0xff]  ;;  %v970_v60 = vld [vmem:[%s4160_s8 + $0x10] sm:$0xff] }
  0x31   : > { %3145 = vmatpush3.bf16.msra.mxu1 %v3144_v21  ;;  %v972_v59 = vpack.c.bf16 %v969_v58, %v968_v57  ;;  %v971_v61 = vld [vmem:[%s4160_s8 + $0x18] sm:$0xff] }
  0x32   : > { %3146 = vmatprep.subr.bf16.mxu1 %v3327_v4  ;;  %v973_v62 = vpack.c.bf16 %v971_v61, %v970_v60 }
  0x35   : > { %3148 = vmatpush3.bf16.msra.mxu1 %v3147_v26  ;;  %v2747_v5 = vld [vmem:[%s4162_s29] ss:$0 sm:$0xff]  ;;  %s737_s29 = sand.u32 1, %s3316_s26  }
  0x36   : > { %3149 = vmatprep.subr.bf16.mxu1 %v3327_v4 }
  0x39   : > { %3151 = vmatpush3.bf16.msra.mxu1 %v3150_v29 }
  0x3a   : > { %3152 = vmatprep.subr.bf16.mxu1 %v3327_v4 }
  0x3d   : > { %3154 = vmatpush3.bf16.msra.mxu1 %v3153_v32 }
  0x3e   : > { %3155 = vmatprep.subr.bf16.mxu1 %v3327_v4 }
  0x41   : > { %3157 = vmatpush3.bf16.msra.mxu1 %v3156_v35 }
  0x42   : > { %3158 = vmatprep.subr.bf16.mxu1 %v3327_v4 }
  0x45   : > { %3160 = vmatpush3.bf16.msra.mxu1 %v3159_v38 }
  0x46   : > { %2976 = vmatprep.subr.bf16.mxu1 %v3329_v12 }
  0xa4   : > { %v759_v40 = vpop.permute.xlu0 %758 }
  0xa5   : > { %vm760_vm2 = vcmp.eq.s32.totalorder %v759_v40, %v749_v39 }
  0xa6   : > { %v2742_v41 = vsel %vm760_vm2, 1.0, %v3329_v12 }
  0xa7   : > { %2913 = vmatmul.mubr.msk.f32.vlgmr.msra.gmra.mrb[0].mxu0 %vm781_vm1, %v2742_v41 }
  0xa8   : > { %2954 = vmatprep.mubr.msk.bf16.mxu0 %vm3328_vm0, %v3329_v12  ;;  %2951 = vmatpush3.bf16.msra.mxu0 %v972_v59 }
  0xa9   : > { %2952 = vmatprep.subr.bf16.mxu0 %v3329_v12 }
  0xaa   : > { %v752_v42 = vpop.permute.xlu0 %751 }
  0xab   : > { %vm753_vm3 = vcmp.eq.s32.totalorder %v752_v42, %v749_v39 }
  0xac   : > { %2948 = vmatmul.mubr.msk.f32.vlgmr.msra.gmra.mrb[0].mxu1 %vm753_vm3, %v3330_v43  ;;  %2953 = vmatpush3.bf16.msra.mxu0 %v973_v62 }
  0xad   : > { %2978 = vmatprep.mubr.msk.bf16.mxu1 %vm3328_vm0, %v3329_v12  ;;  %2958 = vmatprep.subr.bf16.mxu0 %v3329_v12 }
 0x17a   : > { %v851_v44 = vpop.f32.mrb[0].mxu0 }
 0x17b   : > { %v2914_v45 = vpop.f32.mrb[1].mxu0 }
 0x17f   : > { %v921_v46 = vpop.f32.mrb[0].mxu1 }
 0x180   : > { %v922_v48 = vadd.f32 %v921_v46, %v851_v44  ;;  %v2949_v49 = vpop.f32.mrb[1].mxu1 }
 0x182   : > { %v932_v50 = vadd.f32 %v2745_v47, %v922_v48 }
 0x184   : > { %v936_v51 = vsel %vm935_vm4, %v932_v50, 0.0 }
 0x185   : > { %937 = vadd.xlane.f32.xlu1 %v936_v51 }
 0x212   : > { %v938_v52 = vpop.xlane.xlu1 %937 }
 0x213   : > { %v940_v53 = vmul.f32 0.03125, %v938_v52 }
 0x215   : > { %v941_v54 = vsub.f32 %v932_v50, %v940_v53 }
 0x217   : > { %v942_v55 = vmul.f32 %v941_v54, %v941_v54 }
 0x219   : > { %v943_v56 = vsel %vm935_vm4, %v942_v55, 0.0 }
 0x21a   : > { %944 = vadd.xlane.f32.xlu1 %v943_v56 }
 0x2a7   : > { %v945_v63 = vpop.xlane.xlu1 %944 }
 0x2a8   : > { %v946_v0 = vmul.f32 0.03125, %v945_v63 }
 0x2aa   : > { %v947_v1 = vadd.f32 1e-12, %v946_v0 }
 0x2ac   : > { %3214 = vrsqrt.f32 %v947_v1 }
 0x2b6   : > { %v3215_v2 = vpop.eup %3214 }
 0x2b7   : > { %v949_v4 = vmul.f32 %v3215_v2, %v941_v54 }
 0x2b9   : > { %v956_v6 = vmul.f32 %v2746_v3, %v949_v4 }
 0x2bb   : > { %v3617_v7 = vadd.f32 %v2747_v5, %v956_v6 }
 0x2bd   : > { %v967_v8 = vpack.c.bf16 %v3617_v7, %v3617_v7 }
 0x2bf   : > { %2955 = vmatmul.mubr.msk.bf16.vlgmr.msra.gmra.mrb[4].mxu0 %vm935_vm4, %v967_v8 }
 0x2c0   : > { %2960 = vmatprep.mubr.msk.bf16.mxu0 %vm3328_vm0, %v3329_v12 }
 0x392   : > { %v1018_v10 = vpop.f32.mrb[4].mxu0 }
 0x393   : > { %v1019_v11 = vadd.f32 %v2749_v9, %v1018_v10  ;;  %v2956_v13 = vpop.f32.mrb[5].mxu0 }
 0x394   : > { %v1021_v14 = vpop.f32.mrb[6].mxu0 }
 0x395   : > { %1039 = vrot.lane.b32.xlu1 %v1019_v11, %s3331_s4  ;;  %1036 = vrot.lane.b32.xlu0 %v1019_v11, %s3332_s27  ;;  %v2957_v15 = vpop.f32.mrb[7].mxu0  ;;  %v3630_v16 = vpack.c.bf16 %v1019_v11, %v1019_v11  ;;  %v1024_v22 = vmul.f32 0.35355338, %v1019_v11 }
 0x397   : > { %v1045_v27 = vpack.c.bf16 %v1024_v22, %v1024_v22 }
 0x399   : > { %1042 = vrot.lane.b32.xlu0 %v1019_v11, %s3333_s25 }
 0x39d   : > { %1060 = vrot.lane.b32.xlu0 %v3630_v16, %s3334_s1 }
 0x407   : > { %v1040_v17 = vpop.permute.xlu1 %1039  ;;  %v1037_v18 = vpop.permute.xlu0 %1036 }
 0x408   : > { %v3634_v19 = vpack.c.bf16 %v1040_v17, %v1040_v17  ;;  %v3636_v20 = vpack.c.bf16 %v1037_v18, %v1037_v18 }
 0x40a   : > { %1159 = vrot.lane.b32.xlu1 %v3634_v19, %s3334_s1  ;;  %1110 = vrot.lane.b32.xlu0 %v3636_v20, %s3334_s1 }
 0x40b   : > { %v1043_v21 = vpop.permute.xlu0 %1042 }
 0x40c   : > { %v3644_v24 = vpack.c.bf16 %v1043_v21, %v1043_v21 }
 0x40e   : > { %1029 = vrot.lane.b32.xlu1 %v1024_v22, %s3331_s4  ;;  %1026 = vrot.lane.b32.xlu0 %v1024_v22, %s3332_s27 }
 0x40f   : > { %v1061_v23 = vpop.permute.xlu0 %1060 }
 0x410   : > { %v1067_v26 = vsel %vm1062_vm5, %v1061_v23, 0 }
 0x411   : > { %2959 = vmatpush3.bf16.xpose.msra.mxu0 %v1067_v26 }
 0x412   : > { %1208 = vrot.lane.b32.xlu0 %v3644_v24, %s3334_s1  ;;  %2964 = vmatprep.subr.bf16.mxu0 %v3329_v12 }
 0x416   : > { %1032 = vrot.lane.b32.xlu0 %v1024_v22, %s3333_s25 }
 0x418   : > { %2961 = vmatmul.mubr.msk.bf16.vlgmr.msra.gmra.mrb[8].mxu0 %vm1062_vm5, %v1045_v27 }
 0x419   : > { %2966 = vmatprep.mubr.msk.bf16.mxu0 %vm3328_vm0, %v3329_v12 }
 0x47c   : > { %v1111_v28 = vpop.permute.xlu0 %1110  ;;  %v1160_v31 = vpop.permute.xlu1 %1159 }
 0x47d   : > { %v1116_v29 = vsel %vm1062_vm5, %v1111_v28, 0  ;;  %v1165_v34 = vsel %vm1062_vm5, %v1160_v31, 0 }
 0x47e   : > { %2965 = vmatpush3.bf16.xpose.msra.mxu0 %v1116_v29 }
 0x47f   : > { %2970 = vmatprep.subr.bf16.mxu0 %v3329_v12 }
 0x480   : > { %v1027_v30 = vpop.permute.xlu0 %1026  ;;  %v1030_v36 = vpop.permute.xlu1 %1029 }
 0x481   : > { %v1046_v32 = vpack.c.bf16 %v1027_v30, %v1027_v30  ;;  %v1047_v38 = vpack.c.bf16 %v1030_v36, %v1030_v36 }
 0x484   : > { %v1209_v33 = vpop.permute.xlu0 %1208 }
 0x485   : > { %v1214_v35 = vsel %vm1062_vm5, %v1209_v33, 0  ;;  %2967 = vmatmul.mubr.msk.bf16.vlgmr.msra.gmra.mrb[12].mxu0 %vm1062_vm5, %v1046_v32 }
 0x486   : > { %2971 = vmatpush3.bf16.xpose.msra.mxu0 %v1165_v34  ;;  %2977 = vmatpush3.bf16.xpose.msra.mxu1 %v1214_v35 }
 0x487   : > { %2972 = vmatprep.mubr.msk.bf16.mxu0 %vm3328_vm0, %v3329_v12  ;;  %2982 = vmatprep.subr.bf16.mxu0 %v3329_v12 }
 0x488   : > { %v1033_v37 = vpop.permute.xlu0 %1032  ;;  %2988 = vmatprep.subr.bf16.mxu1 %v3329_v12 }
 0x489   : > { %v1048_v39 = vpack.c.bf16 %v1033_v37, %v1033_v37 }
 0x48d   : > { %2973 = vmatmul.mubr.msk.bf16.vlgmr.msra.gmra.mrb[16].mxu0 %vm1062_vm5, %v1047_v38  ;;  %2979 = vmatmul.mubr.msk.bf16.vlgmr.msra.gmra.mrb[4].mxu1 %vm1062_vm5, %v1048_v39 }
 0x48e   : > { %2984 = vmatprep.mubr.msk.bf16.mxu0 %vm3328_vm0, %v3329_v12  ;;  %2990 = vmatprep.mubr.msk.bf16.mxu1 %vm3328_vm0, %v3329_v12 }
 0x4eb   : > { %v1103_v40 = vpop.f32.mrb[8].mxu0 }
 0x4ec   : > { %v1104_v41 = vadd.f32 %v1103_v40, %v3559_v25  ;;  %v2962_v42 = vpop.f32.mrb[9].mxu0 }
 0x4ed   : > { %v1106_v43 = vpop.f32.mrb[10].mxu0 }
 0x4ee   : > { %v2963_v44 = vpop.f32.mrb[11].mxu0  ;;  %v1256_v45 = vsel %vm1062_vm5, %v1104_v41, -inf }
 0x4ef   : > { %1257 = vmax.xlane.f32.xlu1 %v1256_v45 }
 0x558   : > { %v1152_v46 = vpop.f32.mrb[12].mxu0 }
 0x559   : > { %v1153_v47 = vadd.f32 %v1152_v46, %v3559_v25  ;;  %v2968_v48 = vpop.f32.mrb[13].mxu0 }
 0x55a   : > { %v1155_v49 = vpop.f32.mrb[14].mxu0 }
 0x55b   : > { %v2969_v50 = vpop.f32.mrb[15].mxu0  ;;  %v1259_v51 = vsel %vm1062_vm5, %v1153_v47, -inf }
 0x55c   : > { %1260 = vmax.xlane.f32.xlu0 %v1259_v51  ;;  %v1514_v51 = vld [vmem:[%s4100_s10] sm:$0xff] }
 0x560   : > { %v1201_v52 = vpop.f32.mrb[16].mxu0  ;;  %v1250_v53 = vpop.f32.mrb[4].mxu1 }
 0x561   : > { %v1202_v54 = vadd.f32 %v1201_v52, %v3559_v25  ;;  %v1251_v55 = vadd.f32 %v1250_v53, %v3559_v25  ;;  %v2974_v56 = vpop.f32.mrb[17].mxu0  ;;  %v2980_v57 = vpop.f32.mrb[5].mxu1  ;;  %v1515_v52 = vld [vmem:[%s4100_s10 + $0x8] sm:$0xff] }
 0x562   : > { %v1204_v58 = vpop.f32.mrb[18].mxu0  ;;  %v1253_v59 = vpop.f32.mrb[6].mxu1  ;;  %v1518_v53 = vpack.c.bf16 %v1515_v52, %v1514_v51  ;;  %v1673_v52 = vld [vmem:[%s4106_s16 + $0x30] sm:$0xff] }
 0x563   : > { %v2975_v60 = vpop.f32.mrb[19].mxu0  ;;  %v2981_v61 = vpop.f32.mrb[7].mxu1  ;;  %v1262_v62 = vsel %vm1062_vm5, %v1202_v54, -inf  ;;  %v1265_v63 = vsel %vm1062_vm5, %v1251_v55, -inf }
 0x564   : > { %1263 = vmax.xlane.f32.xlu0 %v1262_v62  ;;  %1266 = vmax.xlane.f32.xlu1 %v1265_v63 }
 0x575   : > { %1353 = vrot.lane.b32.xlu1 %v3636_v20, %s3335_s24 }
 0x57a   : > { %1304 = vrot.lane.b32.xlu0 %v3630_v16, %s3335_s24 }
 0x57c   : > { %v1258_v0 = vpop.xlane.xlu1 %1257 }
 0x57d   : > { %v1268_v1 = vsub.f32 %v1104_v41, %v1258_v0 }
 0x57f   : > { %v1272_v2 = vmul.f32 1.442695, %v1268_v1 }
 0x581   : > { %3216 = vpow2.f32 %v1272_v2 }
 0x58b   : > { %v3217_v3 = vpop.eup %3216 }
 0x58c   : > { %v1280_v4 = vsel %vm1062_vm5, %v3217_v3, 0.0 }
 0x599   : > { %1281 = vadd.xlane.f32.xlu0 %v1280_v4 }
 0x5e9   : > { %v1261_v5 = vpop.xlane.xlu0 %1260 }
 0x5ea   : > { %v1269_v6 = vsub.f32 %v1153_v47, %v1261_v5 }
 0x5ec   : > { %v1274_v8 = vmul.f32 1.442695, %v1269_v6 }
 0x5ee   : > { %3218 = vpow2.f32 %v1274_v8 }
 0x5f1   : > { %v1264_v9 = vpop.xlane.xlu0 %1263  ;;  %v1267_v10 = vpop.xlane.xlu1 %1266 }
 0x5f2   : > { %v1270_v11 = vsub.f32 %v1202_v54, %v1264_v9  ;;  %v1271_v13 = vsub.f32 %v1251_v55, %v1267_v10  ;;  %v1516_v54 = vld [vmem:[%s4100_s10 + $0x10] sm:$0xff]  ;;  %v1517_v55 = vld [vmem:[%s4100_s10 + $0x18] sm:$0xff] }
 0x5f3   : > { %v1519_v56 = vpack.c.bf16 %v1517_v55, %v1516_v54  ;;  %v2763_v55 = vld [vmem:[%s4105_s15] ss:$0 sm:$0xff] }
 0x5f4   : > { %v1276_v14 = vmul.f32 1.442695, %v1270_v11  ;;  %v1278_v15 = vmul.f32 1.442695, %v1271_v13 }
 0x5f5   : > { %v1305_v16 = vpop.permute.xlu0 %1304  ;;  %v1354_v17 = vpop.permute.xlu1 %1353 }
 0x5f6   : > { %3220 = vpow2.f32 %v1276_v14  ;;  %v1311_v18 = vsel %vm1309_vm6, %v1305_v16, 0  ;;  %v1359_v20 = vsel %vm1309_vm6, %v1354_v17, 0  ;;  %v2759_v14 = vld [vmem:[%s4101_s11] ss:$0 sm:$0xff] }
 0x5f7   : > { %3222 = vpow2.f32 %v1278_v15  ;;  %2983 = vmatpush3.bf16.msra.mxu0 %v1311_v18  ;;  %2989 = vmatpush3.bf16.msra.mxu1 %v1359_v20 }
 0x5f8   : > { %v3219_v21 = vpop.eup %3218  ;;  %2994 = vmatprep.subr.bf16.mxu0 %v3329_v12  ;;  %3000 = vmatprep.subr.bf16.mxu1 %v3329_v12 }
 0x5f9   : > { %v1283_v22 = vsel %vm1062_vm5, %v3219_v21, 0.0 }
 0x5fa   : > { %1284 = vadd.xlane.f32.xlu1 %v1283_v22 }
 0x600   : > { %v3221_v23 = vpop.eup %3220 }
 0x601   : > { %v3223_v26 = vpop.eup %3222  ;;  %v1286_v27 = vsel %vm1062_vm5, %v3221_v23, 0.0 }
 0x602   : > { %1287 = vadd.xlane.f32.xlu0 %v1286_v27  ;;  %v1289_v28 = vsel %vm1062_vm5, %v3223_v26, 0.0 }
 0x603   : > { %1290 = vadd.xlane.f32.xlu1 %v1289_v28 }
 0x614   : > { %1401 = vrot.lane.b32.xlu1 %v3634_v19, %s3335_s24 }
 0x618   : > { %1449 = vrot.lane.b32.xlu0 %v3644_v24, %s3335_s24 }
 0x626   : > { %v1282_v29 = vpop.xlane.xlu0 %1281 }
 0x627   : > { %3224 = vrcp.f32 %v1282_v29 }
 0x631   : > { %v3225_v30 = vpop.eup %3224 }
 0x632   : > { %v1296_v31 = vmul.f32 %v3225_v30, %v3217_v3  ;;  %v1601_v30 = vld [vmem:[%s4104_s14] sm:$0xff] }
 0x634   : > { %v1300_v32 = vpack.c.bf16 %v1296_v31, %v1296_v31  ;;  %v1602_v31 = vld [vmem:[%s4104_s14 + $0x8] sm:$0xff] }
 0x636   : > { %2985 = vmatmul.mubr.msk.bf16.vlgmr.msra.gmra.mrb[20].mxu0 %vm1062_vm5, %v1300_v32  ;;  %v1605_v32 = vpack.c.bf16 %v1602_v31, %v1601_v30 }
 0x637   : > { %2996 = vmatprep.mubr.msk.bf16.mxu0 %vm3328_vm0, %v3329_v12 }
 0x687   : > { %v1285_v33 = vpop.xlane.xlu1 %1284 }
 0x688   : > { %3226 = vrcp.f32 %v1285_v33  ;;  %v1604_v33 = vld [vmem:[%s4104_s14 + $0x18] sm:$0xff] }
 0x68f   : > { %v1288_v34 = vpop.xlane.xlu0 %1287 }
 0x690   : > { %3228 = vrcp.f32 %v1288_v34  ;;  %v1291_v35 = vpop.xlane.xlu1 %1290 }
 0x691   : > { %3230 = vrcp.f32 %v1291_v35 }
 0x692   : > { %v3227_v19 = vpop.eup %3226 }
 0x693   : > { %v1297_v36 = vmul.f32 %v3227_v19, %v3219_v21  ;;  %v1450_v37 = vpop.permute.xlu0 %1449 }
 0x694   : > { %v1402_v24 = vpop.permute.xlu1 %1401  ;;  %v1455_v40 = vsel %vm1309_vm6, %v1450_v37, 0 }
 0x695   : > { %v1407_v38 = vsel %vm1309_vm6, %v1402_v24, 0  ;;  %v1301_v39 = vpack.c.bf16 %v1297_v36, %v1297_v36  ;;  %v2761_v24 = vld [vmem:[%s4102_s12] ss:$0 sm:$0xff] }
 0x696   : > { %2995 = vmatpush3.bf16.msra.mxu0 %v1407_v38 }
 0x697   : > { %2991 = vmatmul.mubr.msk.bf16.vlgmr.msra.gmra.mrb[8].mxu1 %vm1062_vm5, %v1301_v39  ;;  %3006 = vmatprep.subr.bf16.mxu0 %v3329_v12  ;;  %v2762_v39 = vld [vmem:[%s4103_s13] ss:$0 sm:$0xff] }
 0x698   : > { %3001 = vmatpush3.bf16.msra.mxu1 %v1455_v40  ;;  %3002 = vmatprep.mubr.msk.bf16.mxu1 %vm3328_vm0, %v3329_v12 }
 0x699   : > { %3014 = vmatprep.subr.bf16.mxu1 %v3329_v12 }
 0x69a   : > { %v3229_v41 = vpop.eup %3228 }
 0x69b   : > { %v3231_v42 = vpop.eup %3230  ;;  %v1298_v43 = vmul.f32 %v3229_v41, %v3221_v23 }
 0x69c   : > { %v1299_v44 = vmul.f32 %v3231_v42, %v3223_v26 }
 0x69d   : > { %v1302_v45 = vpack.c.bf16 %v1298_v43, %v1298_v43  ;;  %v1667_v43 = vld [vmem:[%s4106_s16] sm:$0xff] }
 0x69e   : > { %v1303_v46 = vpack.c.bf16 %v1299_v44, %v1299_v44  ;;  %v1668_v44 = vld [vmem:[%s4106_s16 + $0x8] sm:$0xff] }
 0x69f   : > { %2997 = vmatmul.mubr.msk.bf16.vlgmr.msra.gmra.mrb[24].mxu0 %vm1062_vm5, %v1302_v45  ;;  %v1669_v45 = vld [vmem:[%s4106_s16 + $0x10] sm:$0xff] }
 0x6a0   : > { %3003 = vmatmul.mubr.msk.bf16.vlgmr.msra.gmra.mrb[12].mxu1 %vm1062_vm5, %v1303_v46  ;;  %3010 = vmatprep.mubr.msk.bf16.mxu0 %vm3328_vm0, %v3329_v12  ;;  %v1675_v46 = vpack.c.bf16 %v1668_v44, %v1667_v43 }
 0x6a1   : > { %3018 = vmatprep.mubr.msk.bf16.mxu1 %vm3328_vm0, %v3329_v12  ;;  %3007 = vmatpush3.bf16.msra.mxu0 %v1518_v53  ;;  %v1674_v53 = vld [vmem:[%s4106_s16 + $0x38] sm:$0xff] }
 0x6a2   : > { %3008 = vmatprep.subr.bf16.mxu0 %v3329_v12  ;;  %3015 = vmatpush3.bf16.msra.mxu1 %v1605_v32  ;;  %v1678_v54 = vpack.c.bf16 %v1674_v53, %v1673_v52 }
 0x6a3   : > { %3016 = vmatprep.subr.bf16.mxu1 %v3329_v12 }
 0x6a5   : > { %3009 = vmatpush3.bf16.msra.mxu0 %v1519_v56 }
 0x6a6   : > { %3022 = vmatprep.subr.bf16.mxu0 %v3329_v12 }
 0x709   : > { %v1347_v47 = vpop.f32.mrb[20].mxu0 }
 0x70a   : > { %v2986_v48 = vpop.f32.mrb[21].mxu0 }
 0x70b   : > { %v1350_v49 = vpop.f32.mrb[22].mxu0 }
 0x70c   : > { %v2987_v50 = vpop.f32.mrb[23].mxu0  ;;  %v1671_v49 = vld [vmem:[%s4106_s16 + $0x20] sm:$0xff] }
 0x70d   : > { %v1672_v50 = vld [vmem:[%s4106_s16 + $0x28] sm:$0xff] }
 0x70e   : > { %v1677_v51 = vpack.c.bf16 %v1672_v50, %v1671_v49 }
 0x76a   : > { %v1395_v57 = vpop.f32.mrb[8].mxu1 }
 0x76b   : > { %1498 = vrot.lane.b32.xlu1 %v1395_v57, %s4130_s0  ;;  %v2992_v58 = vpop.f32.mrb[9].mxu1  ;;  %s738_s0 = scalar_lea.vmem [#allocation2], %s737_s29 }
 0x76c   : > { %v1398_v59 = vpop.f32.mrb[10].mxu1  ;;  %s2672_s2 = sshll.u32 %s738_s0, 4  ;;  %s4050_s2 = int_to_ptr.vmem [resolvable:$true] %s2672_s2 }
 0x76d   : > { %v2993_v60 = vpop.f32.mrb[11].mxu1 }
 0x772   : > { %v1443_v61 = vpop.f32.mrb[24].mxu0 }
 0x773   : > { %v1491_v62 = vpop.f32.mrb[12].mxu1  ;;  %1502 = vrot.lane.b32.xlu0 %v1443_v61, %s4129_s23  ;;  %v2998_v63 = vpop.f32.mrb[25].mxu0 }
 0x774   : > { %1506 = vrot.lane.b32.xlu1 %v1491_v62, %s4128_s5  ;;  %v3004_v0 = vpop.f32.mrb[13].mxu1  ;;  %v1446_v1 = vpop.f32.mrb[26].mxu0  ;;  %s4163_s5 = smov 8  }
 0x775   : > { %v1494_v2 = vpop.f32.mrb[14].mxu1  ;;  %v2999_v3 = vpop.f32.mrb[27].mxu0 }
 0x776   : > { %v3005_v4 = vpop.f32.mrb[15].mxu1 }
 0x7dd   : > { %v1499_v5 = vpop.permute.xlu1 %1498 }
 0x7de   : > { %v1509_v6 = vsel %vm1062_vm5, %v1347_v47, %v1499_v5  ;;  %v1670_v47 = vld [vmem:[%s4106_s16 + $0x18] sm:$0xff] }
 0x7df   : > { %v1676_v48 = vpack.c.bf16 %v1670_v47, %v1669_v45 }
 0x7e5   : > { %v1503_v8 = vpop.permute.xlu0 %1502 }
 0x7e6   : > { %v1510_v9 = vsel %vm781_vm1, %v1509_v6, %v1503_v8  ;;  %v1507_v10 = vpop.permute.xlu1 %1506  ;;  %v2765_v8 = vld [vmem:[%s4107_s17] ss:$0 sm:$0xff] }
 0x7e7   : > { %v1512_v11 = vsel %vm1511_vm7, %v1510_v9, %v1507_v10 }
 0x7e8   : > { %v1513_v13 = vpack.c.bf16 %v1512_v11, %v1512_v11 }
 0x7ea   : > { %3011 = vmatmul.mubr.msk.bf16.vlgmr.msra.gmra.mrb[28].mxu0 %vm935_vm4, %v1513_v13 }
 0x7eb   : > { %3030 = vmatprep.mubr.msk.bf16.mxu0 %vm3328_vm0, %v3329_v12  ;;  %3023 = vmatpush3.bf16.msra.mxu0 %v1675_v46 }
 0x7ec   : > { %3024 = vmatprep.subr.bf16.mxu0 %v3329_v12 }
 0x7ef   : > { %3025 = vmatpush3.bf16.msra.mxu0 %v1676_v48 }
 0x7f0   : > { %3026 = vmatprep.subr.bf16.mxu0 %v3329_v12 }
 0x7f3   : > { %3027 = vmatpush3.bf16.msra.mxu0 %v1677_v51 }
 0x7f4   : > { %3028 = vmatprep.subr.bf16.mxu0 %v3329_v12 }
 0x7f7   : > { %3029 = vmatpush3.bf16.msra.mxu0 %v1678_v54 }
 0x7f8   : > { %3048 = vmatprep.subr.bf16.mxu0 %v3329_v12 }
 0x8bd   : > { %v1564_v15 = vpop.f32.mrb[28].mxu0 }
 0x8be   : > { %v1565_v16 = vadd.f32 %v2759_v14, %v1564_v15  ;;  %v3012_v17 = vpop.f32.mrb[29].mxu0 }
 0x8bf   : > { %v1567_v18 = vpop.f32.mrb[30].mxu0 }
 0x8c0   : > { %v3013_v20 = vpop.f32.mrb[31].mxu0  ;;  %v1570_v21 = vadd.f32 %v1565_v16, %v3617_v7  ;;  %v1603_v7 = vld [vmem:[%s4104_s14 + $0x10] sm:$0xff] }
 0x8c1   : > { %v1606_v34 = vpack.c.bf16 %v1604_v33, %v1603_v7 }
 0x8c2   : > { %v1573_v22 = vsel %vm935_vm4, %v1570_v21, 0.0 }
 0x8c3   : > { %1574 = vadd.xlane.f32.xlu0 %v1573_v22  ;;  %3017 = vmatpush3.bf16.msra.mxu1 %v1606_v34  ;;  %v2767_v34 = vld [vmem:[%s4108_s18] ss:$0 sm:$0xff] }
 0x8c4   : > { %3034 = vmatprep.subr.bf16.mxu1 %v3329_v12 }
 0x950   : > { %v1575_v23 = vpop.xlane.xlu0 %1574 }
 0x951   : > { %v1576_v26 = vmul.f32 0.03125, %v1575_v23  ;;  %v2769_v23 = vld [vmem:[%s4160_s8 + $0x20] sm:$0xff] }
 0x953   : > { %v1577_v27 = vsub.f32 %v1570_v21, %v1576_v26  ;;  %v2770_v26 = vld [vmem:[%s4160_s8 + $0x28] sm:$0xff] }
 0x955   : > { %v1578_v28 = vmul.f32 %v1577_v27, %v1577_v27 }
 0x957   : > { %v1579_v29 = vsel %vm935_vm4, %v1578_v28, 0.0  ;;  %v2771_v28 = vld [vmem:[%s4160_s8 + $0x30] sm:$0xff] }
 0x958   : > { %1580 = vadd.xlane.f32.xlu1 %v1579_v29  ;;  %v2772_v29 = vld [vmem:[%s4160_s8 + $0x38] sm:$0xff] }
 0x959   : > { %v1767_v30 = vpack.c.bf16 %v2772_v29, %v2771_v28 }
 0x9e5   : > { %v1581_v35 = vpop.xlane.xlu1 %1580 }
 0x9e6   : > { %v1582_v19 = vmul.f32 0.03125, %v1581_v35 }
 0x9e8   : > { %v1583_v36 = vadd.f32 1e-12, %v1582_v19  ;;  %v2768_v19 = vld [vmem:[%s4109_s19] ss:$0 sm:$0xff] }
 0x9ea   : > { %3232 = vrsqrt.f32 %v1583_v36 }
 0x9f4   : > { %v3233_v37 = vpop.eup %3232 }
 0x9f5   : > { %v1585_v38 = vmul.f32 %v3233_v37, %v1577_v27  ;;  %v1766_v27 = vpack.c.bf16 %v2770_v26, %v2769_v23 }
 0x9f7   : > { %v1592_v40 = vmul.f32 %v2761_v24, %v1585_v38  ;;  %v2774_v38 = vld [vmem:[%s4099_s9 + $0x1] ss:$0 sm:$0xff] }
 0x9f9   : > { %v1599_v41 = vadd.f32 %v2762_v39, %v1592_v40 }
 0x9fb   : > { %v1600_v42 = vpack.c.bf16 %v1599_v41, %v1599_v41 }
 0x9fd   : > { %3019 = vmatmul.mubr.msk.bf16.vlgmr.msra.gmra.mrb[16].mxu1 %vm935_vm4, %v1600_v42 }
 0x9fe   : > { %3038 = vmatprep.mubr.msk.bf16.mxu1 %vm3328_vm0, %v3329_v12  ;;  %3035 = vmatpush3.bf16.msra.mxu1 %v1766_v27 }
 0x9ff   : > { %3036 = vmatprep.subr.bf16.mxu1 %v3329_v12 }
 0xa02   : > { %3037 = vmatpush3.bf16.msra.mxu1 %v1767_v30 }
 0xa03   : > { %3042 = vmatprep.subr.bf16.mxu1 %v3329_v12 }
 0xad0   : > { %v1651_v56 = vpop.f32.mrb[16].mxu1 }
 0xad1   : > { %v1652_v57 = vadd.f32 %v2763_v55, %v1651_v56  ;;  %v3020_v58 = vpop.f32.mrb[17].mxu1 }
 0xad2   : > { %v1654_v59 = vpop.f32.mrb[18].mxu1 }
 0xad3   : > { %v1658_v60 = vmul.f32 0.044715, %v1652_v57  ;;  %v3021_v61 = vpop.f32.mrb[19].mxu1  ;;  %v1657_v3 = vmul.f32 0.5, %v1652_v57 }
 0xad5   : > { %v1659_v62 = vmul.f32 %v1658_v60, %v1652_v57 }
 0xad7   : > { %v1660_v63 = vmul.f32 %v1659_v62, %v1652_v57 }
 0xad9   : > { %v1661_v0 = vadd.f32 %v1660_v63, %v1652_v57 }
 0xadb   : > { %v1662_v1 = vmul.f32 0.7978846, %v1661_v0 }
 0xadd   : > { %3234 = vtanh.f32 %v1662_v1 }
 0xae7   : > { %v3235_v2 = vpop.eup %3234 }
 0xae8   : > { %v1664_v4 = vadd.f32 1.0, %v3235_v2 }
 0xaea   : > { %v1665_v5 = vmul.f32 %v1664_v4, %v1657_v3 }
 0xaec   : > { %v1666_v6 = vpack.c.bf16 %v1665_v5, %v1665_v5 }
 0xaee   : > { %3031 = vmatmul.mubr.msk.bf16.vlgmr.msra.gmra.mrb[32].mxu0 %vm1686_vm8, %v1666_v6 }
 0xaef   : > { %3050 = vmatprep.mubr.msk.bf16.mxu0 %vm3328_vm0, %v3329_v12 }
 0xbc1   : > { %v1724_v9 = vpop.f32.mrb[32].mxu0 }
 0xbc2   : > { %v1725_v10 = vadd.f32 %v2765_v8, %v1724_v9  ;;  %v3032_v11 = vpop.f32.mrb[33].mxu0 }
 0xbc3   : > { %v1727_v13 = vpop.f32.mrb[34].mxu0 }
 0xbc4   : > { %v3033_v14 = vpop.f32.mrb[35].mxu0  ;;  %v1730_v15 = vadd.f32 %v1725_v10, %v1599_v41 }
 0xbc6   : > { %v1733_v16 = vsel %vm935_vm4, %v1730_v15, 0.0 }
 0xbc7   : > { %1734 = vadd.xlane.f32.xlu0 %v1733_v16 }
 0xc54   : > { %v1735_v17 = vpop.xlane.xlu0 %1734 }
 0xc55   : > { %v1736_v18 = vmul.f32 0.03125, %v1735_v17 }
 0xc57   : > { %v1737_v20 = vsub.f32 %v1730_v15, %v1736_v18 }
 0xc59   : > { %v1738_v21 = vmul.f32 %v1737_v20, %v1737_v20 }
 0xc5b   : > { %v1739_v22 = vsel %vm935_vm4, %v1738_v21, 0.0 }
 0xc5c   : > { %1740 = vadd.xlane.f32.xlu0 %v1739_v22 }
 0xce9   : > { %v1741_v31 = vpop.xlane.xlu0 %1740 }
 0xcea   : > { %v1742_v32 = vmul.f32 0.03125, %v1741_v31 }
 0xcec   : > { %v1743_v7 = vadd.f32 1e-12, %v1742_v32 }
 0xcee   : > { %3236 = vrsqrt.f32 %v1743_v7 }
 0xcf8   : > { %v3237_v33 = vpop.eup %3236 }
 0xcf9   : > { %v1745_v35 = vmul.f32 %v3237_v33, %v1737_v20 }
 0xcfb   : > { %v1752_v36 = vmul.f32 %v2767_v34, %v1745_v35 }
 0xcfd   : > { %v3820_v37 = vadd.f32 %v2768_v19, %v1752_v36 }
 0xcff   : > { %v1760_v24 = vpack.c.bf16 %v3820_v37, %v3820_v37 }
 0xd01   : > { %3039 = vmatmul.mubr.msk.bf16.vlgmr.msra.gmra.mrb[20].mxu1 %vm935_vm4, %v1760_v24 }
 0xd02   : > { %3044 = vmatprep.mubr.msk.bf16.mxu1 %vm3328_vm0, %v3329_v12 }
 0xdd4   : > { %v1813_v39 = vpop.f32.mrb[20].mxu1 }
 0xdd5   : > { %v1814_v40 = vadd.f32 %v2774_v38, %v1813_v39  ;;  %v3040_v41 = vpop.f32.mrb[21].mxu1 }
 0xdd6   : > { %v1816_v42 = vpop.f32.mrb[22].mxu1 }
 0xdd7   : > { %1834 = vrot.lane.b32.xlu0 %v1814_v40, %s3331_s4  ;;  %1831 = vrot.lane.b32.xlu1 %v1814_v40, %s3332_s27  ;;  %v3041_v43 = vpop.f32.mrb[23].mxu1  ;;  %v3833_v44 = vpack.c.bf16 %v1814_v40, %v1814_v40  ;;  %v1819_v45 = vmul.f32 0.35355338, %v1814_v40 }
 0xdd9   : > { %v1840_v54 = vpack.c.bf16 %v1819_v45, %v1819_v45 }
 0xddb   : > { %1837 = vrot.lane.b32.xlu1 %v1814_v40, %s3333_s25 }
 0xddf   : > { %1849 = vrot.lane.b32.xlu1 %v3833_v44, %s3334_s1 }
 0xde3   : > { %1821 = vrot.lane.b32.xlu1 %v1819_v45, %s3332_s27 }
 0xe49   : > { %v1832_v46 = vpop.permute.xlu1 %1831  ;;  %v1835_v48 = vpop.permute.xlu0 %1834 }
 0xe4a   : > { %v3838_v47 = vpack.c.bf16 %v1832_v46, %v1832_v46  ;;  %v3842_v50 = vpack.c.bf16 %v1835_v48, %v1835_v48 }
 0xe4c   : > { %1898 = vrot.lane.b32.xlu0 %v3838_v47, %s3334_s1 }
 0xe4d   : > { %v1838_v49 = vpop.permute.xlu1 %1837 }
 0xe4e   : > { %v3844_v51 = vpack.c.bf16 %v1838_v49, %v1838_v49 }
 0xe50   : > { %1947 = vrot.lane.b32.xlu0 %v3842_v50, %s3334_s1  ;;  %1996 = vrot.lane.b32.xlu1 %v3844_v51, %s3334_s1 }
 0xe51   : > { %v1850_v52 = vpop.permute.xlu1 %1849 }
 0xe52   : > { %v1855_v53 = vsel %vm1062_vm5, %v1850_v52, 0 }
 0xe53   : > { %3043 = vmatpush3.bf16.xpose.msra.mxu1 %v1855_v53 }
 0xe54   : > { %1824 = vrot.lane.b32.xlu0 %v1819_v45, %s3331_s4  ;;  %1827 = vrot.lane.b32.xlu1 %v1819_v45, %s3333_s25  ;;  %s4168_s25 = sld [smem:[#allocation23_spill]]  ;;  %s3339_s4 = smov [#allocation2]  }
 0xe55   : > { %3054 = vmatprep.subr.bf16.mxu1 %v3329_v12  ;;  %v1822_v57 = vpop.permute.xlu1 %1821  ;;  %s3266_s27 = sshll.u32 %s3339_s4, 4  ;;  %s3267_s27 = int_to_ptr.vmem [resolvable:$false] %s3266_s27 }
 0xe56   : > { %v1841_v61 = vpack.c.bf16 %v1822_v57, %v1822_v57  ;;  %p3269_p0 = scmp.lt.s32.totalorder %s4050_s2, %s3267_s27 }
 0xe5a   : > { %3045 = vmatmul.mubr.msk.bf16.vlgmr.msra.gmra.mrb[24].mxu1 %vm1062_vm5, %v1840_v54 }
 0xe5b   : > { %3056 = vmatprep.mubr.msk.bf16.mxu1 %vm3328_vm0, %v3329_v12 }
 0xebe   : > { %v1899_v55 = vpop.permute.xlu0 %1898 }
 0xebf   : > { %v1904_v56 = vsel %vm1062_vm5, %v1899_v55, 0 }
 0xec0   : > { %3049 = vmatpush3.bf16.xpose.msra.mxu0 %v1904_v56 }
 0xec1   : > { %3060 = vmatprep.subr.bf16.mxu0 %v3329_v12 }
 0xec2   : > { %v1948_v58 = vpop.permute.xlu0 %1947  ;;  %v1997_v60 = vpop.permute.xlu1 %1996 }
 0xec3   : > { %v1953_v59 = vsel %vm1062_vm5, %v1948_v58, 0  ;;  %v2002_v63 = vsel %vm1062_vm5, %v1997_v60, 0 }
 0xec4   : > { %3055 = vmatpush3.bf16.xpose.msra.mxu1 %v1953_v59 }
 0xec5   : > { %3066 = vmatprep.subr.bf16.mxu1 %v3329_v12 }
 0xec6   : > { %v1825_v62 = vpop.permute.xlu0 %1824  ;;  %v1828_v1 = vpop.permute.xlu1 %1827 }
 0xec7   : > { %3051 = vmatmul.mubr.msk.bf16.vlgmr.msra.gmra.mrb[36].mxu0 %vm1062_vm5, %v1841_v61  ;;  %v1842_v0 = vpack.c.bf16 %v1825_v62, %v1825_v62  ;;  %v1843_v2 = vpack.c.bf16 %v1828_v1, %v1828_v1 }
 0xec8   : > { %3061 = vmatpush3.bf16.xpose.msra.mxu0 %v2002_v63  ;;  %3062 = vmatprep.mubr.msk.bf16.mxu0 %vm3328_vm0, %v3329_v12 }
 0xec9   : > { %3072 = vmatprep.subr.bf16.mxu0 %v3329_v12 }
 0xecb   : > { %3057 = vmatmul.mubr.msk.bf16.vlgmr.msra.gmra.mrb[28].mxu1 %vm1062_vm5, %v1842_v0 }
 0xecc   : > { %3068 = vmatprep.mubr.msk.bf16.mxu1 %vm3328_vm0, %v3329_v12 }
 0xecf   : > { %3063 = vmatmul.mubr.msk.bf16.vlgmr.msra.gmra.mrb[40].mxu0 %vm1062_vm5, %v1843_v2 }
 0xed0   : > { %3074 = vmatprep.mubr.msk.bf16.mxu0 %vm3328_vm0, %v3329_v12 }
 0xf2d   : > { %v1891_v3 = vpop.f32.mrb[24].mxu1 }
 0xf2e   : > { %v1892_v4 = vadd.f32 %v1891_v3, %v3559_v25  ;;  %v3046_v5 = vpop.f32.mrb[25].mxu1 }
 0xf2f   : > { %v1894_v6 = vpop.f32.mrb[26].mxu1 }
 0xf30   : > { %v3047_v8 = vpop.f32.mrb[27].mxu1  ;;  %v2044_v9 = vsel %vm1062_vm5, %v1892_v4, -inf }
 0xf31   : > { %2045 = vmax.xlane.f32.xlu0 %v2044_v9 }
 0xf9a   : > { %v1940_v10 = vpop.f32.mrb[36].mxu0 }
 0xf9b   : > { %v1941_v11 = vadd.f32 %v1940_v10, %v3559_v25  ;;  %v3052_v13 = vpop.f32.mrb[37].mxu0 }
 0xf9c   : > { %v1943_v14 = vpop.f32.mrb[38].mxu0 }
 0xf9d   : > { %v3053_v15 = vpop.f32.mrb[39].mxu0  ;;  %v2047_v16 = vsel %vm1062_vm5, %v1941_v11, -inf }
 0xf9e   : > { %2048 = vmax.xlane.f32.xlu1 %v2047_v16  ;;  %v1989_v17 = vpop.f32.mrb[28].mxu1  ;;  %v2784_v15 = vld [vmem:[%s4100_s10 + $0x20] sm:$0xff]  ;;  %v2785_v16 = vld [vmem:[%s4100_s10 + $0x28] sm:$0xff] }
 0xf9f   : > { %v1990_v18 = vadd.f32 %v1989_v17, %v3559_v25  ;;  %v3058_v20 = vpop.f32.mrb[29].mxu1  ;;  %v2305_v17 = vpack.c.bf16 %v2785_v16, %v2784_v15  ;;  %v2808_v15 = vld [vmem:[%s4106_s16 + $0x70] sm:$0xff]  ;;  %v2809_v16 = vld [vmem:[%s4106_s16 + $0x78] sm:$0xff] }
 0xfa0   : > { %v1992_v21 = vpop.f32.mrb[30].mxu1  ;;  %v2787_v20 = vld [vmem:[%s4100_s10 + $0x38] sm:$0xff] }
 0xfa1   : > { %v3059_v22 = vpop.f32.mrb[31].mxu1  ;;  %v2050_v23 = vsel %vm1062_vm5, %v1990_v18, -inf }
 0xfa2   : > { %v2038_v26 = vpop.f32.mrb[40].mxu0  ;;  %2051 = vmax.xlane.f32.xlu0 %v2050_v23 }
 0xfa3   : > { %v2039_v27 = vadd.f32 %v2038_v26, %v3559_v25  ;;  %v3064_v28 = vpop.f32.mrb[41].mxu0 }
 0xfa4   : > { %v2041_v29 = vpop.f32.mrb[42].mxu0 }
 0xfa5   : > { %v3065_v30 = vpop.f32.mrb[43].mxu0  ;;  %v2053_v31 = vsel %vm1062_vm5, %v2039_v27, -inf }
 0xfa6   : > { %2054 = vmax.xlane.f32.xlu0 %v2053_v31 }
 0xfaf   : > { %2092 = vrot.lane.b32.xlu1 %v3833_v44, %s3335_s24 }
 0xfbe   : > { %v2046_v32 = vpop.xlane.xlu0 %2045 }
 0xfbf   : > { %v2056_v7 = vsub.f32 %v1892_v4, %v2046_v32 }
 0xfc1   : > { %v2060_v33 = vmul.f32 1.442695, %v2056_v7 }
 0xfc3   : > { %3238 = vpow2.f32 %v2060_v33 }
 0xfcd   : > { %v3239_v34 = vpop.eup %3238 }
 0xfce   : > { %v2068_v35 = vsel %vm1062_vm5, %v3239_v34, 0.0 }
 0xfd3   : > { %2069 = vadd.xlane.f32.xlu1 %v2068_v35 }
0x102b   : > { %v2049_v19 = vpop.xlane.xlu1 %2048 }
0x102c   : > { %v2057_v36 = vsub.f32 %v1941_v11, %v2049_v19 }
0x102e   : > { %v2062_v25 = vmul.f32 1.442695, %v2057_v36 }
0x102f   : > { %v2093_v24 = vpop.permute.xlu1 %2092  ;;  %v2052_v38 = vpop.xlane.xlu0 %2051 }
0x1030   : > { %3240 = vpow2.f32 %v2062_v25  ;;  %v2098_v39 = vsel %vm1309_vm6, %v2093_v24, 0  ;;  %v2058_v40 = vsub.f32 %v1990_v18, %v2052_v38  ;;  %v2786_v18 = vld [vmem:[%s4100_s10 + $0x30] sm:$0xff] }
0x1031   : > { %3067 = vmatpush3.bf16.msra.mxu1 %v2098_v39  ;;  %v2306_v21 = vpack.c.bf16 %v2787_v20, %v2786_v18  ;;  %v2800_v18 = vld [vmem:[%s4105_s15 + $0x1] ss:$0 sm:$0xff] }
0x1032   : > { %v2064_v41 = vmul.f32 1.442695, %v2058_v40  ;;  %3078 = vmatprep.subr.bf16.mxu1 %v3329_v12  ;;  %v2789_v40 = vld [vmem:[%s4101_s11 + $0x1] ss:$0 sm:$0xff] }
0x1033   : > { %v2055_v42 = vpop.xlane.xlu0 %2054 }
0x1034   : > { %3242 = vpow2.f32 %v2064_v41  ;;  %v2059_v43 = vsub.f32 %v2039_v27, %v2055_v42 }
0x1036   : > { %v2066_v44 = vmul.f32 1.442695, %v2059_v43 }
0x1038   : > { %3244 = vpow2.f32 %v2066_v44 }
0x103a   : > { %v3241_v45 = vpop.eup %3240 }
0x103b   : > { %v2071_v46 = vsel %vm1062_vm5, %v3241_v45, 0.0 }
0x103c   : > { %2072 = vadd.xlane.f32.xlu0 %v2071_v46 }
0x103e   : > { %v3243_v48 = vpop.eup %3242 }
0x103f   : > { %v2074_v49 = vsel %vm1062_vm5, %v3243_v48, 0.0 }
0x1040   : > { %2075 = vadd.xlane.f32.xlu1 %v2074_v49 }
0x1042   : > { %v3245_v52 = vpop.eup %3244 }
0x1043   : > { %v2077_v53 = vsel %vm1062_vm5, %v3245_v52, 0.0 }
0x1044   : > { %2078 = vadd.xlane.f32.xlu0 %v2077_v53 }
0x1051   : > { %2188 = vrot.lane.b32.xlu1 %v3842_v50, %s3335_s24 }
0x1055   : > { %2236 = vrot.lane.b32.xlu1 %v3844_v51, %s3335_s24 }
0x105a   : > { %2140 = vrot.lane.b32.xlu0 %v3838_v47, %s3335_s24 }
0x1060   : > { %v2070_v54 = vpop.xlane.xlu1 %2069 }
0x1061   : > { %3246 = vrcp.f32 %v2070_v54 }
0x106b   : > { %v3247_v55 = vpop.eup %3246 }
0x106c   : > { %v2084_v56 = vmul.f32 %v3247_v55, %v3239_v34 }
0x106e   : > { %v2088_v57 = vpack.c.bf16 %v2084_v56, %v2084_v56  ;;  %v2795_v56 = vld [vmem:[%s4104_s14 + $0x20] sm:$0xff] }
0x1070   : > { %3069 = vmatmul.mubr.msk.bf16.vlgmr.msra.gmra.mrb[32].mxu1 %vm1062_vm5, %v2088_v57  ;;  %v2796_v57 = vld [vmem:[%s4104_s14 + $0x28] sm:$0xff] }
0x1071   : > { %3080 = vmatprep.mubr.msk.bf16.mxu1 %vm3328_vm0, %v3329_v12 }
0x10c9   : > { %v2073_v58 = vpop.xlane.xlu0 %2072 }
0x10ca   : > { %3248 = vrcp.f32 %v2073_v58  ;;  %v2396_v58 = vpack.c.bf16 %v2796_v57, %v2795_v56 }
0x10cd   : > { %v2076_v59 = vpop.xlane.xlu1 %2075 }
0x10ce   : > { %3250 = vrcp.f32 %v2076_v59  ;;  %v2798_v59 = vld [vmem:[%s4104_s14 + $0x38] sm:$0xff] }
0x10d1   : > { %v2189_v50 = vpop.permute.xlu1 %2188  ;;  %v2079_v60 = vpop.xlane.xlu0 %2078 }
0x10d2   : > { %v2194_v51 = vsel %vm1309_vm6, %v2189_v50, 0  ;;  %3252 = vrcp.f32 %v2079_v60 }
0x10d3   : > { %3079 = vmatpush3.bf16.msra.mxu1 %v2194_v51 }
0x10d4   : > { %v3249_v47 = vpop.eup %3248  ;;  %3090 = vmatprep.subr.bf16.mxu1 %v3329_v12 }
0x10d5   : > { %v2085_v61 = vmul.f32 %v3249_v47, %v3241_v45  ;;  %v2141_v62 = vpop.permute.xlu0 %2140  ;;  %v2237_v0 = vpop.permute.xlu1 %2236 }
0x10d6   : > { %v2146_v63 = vsel %vm1309_vm6, %v2141_v62, 0  ;;  %v2242_v4 = vsel %vm1309_vm6, %v2237_v0, 0  ;;  %v2793_v62 = vld [vmem:[%s4102_s12 + $0x1] ss:$0 sm:$0xff] }
0x10d7   : > { %3073 = vmatpush3.bf16.msra.mxu0 %v2146_v63  ;;  %v2089_v1 = vpack.c.bf16 %v2085_v61, %v2085_v61  ;;  %v2794_v0 = vld [vmem:[%s4103_s13 + $0x1] ss:$0 sm:$0xff] }
0x10d8   : > { %v3251_v2 = vpop.eup %3250  ;;  %3084 = vmatprep.subr.bf16.mxu0 %v3329_v12 }
0x10d9   : > { %v2086_v3 = vmul.f32 %v3251_v2, %v3243_v48 }
0x10da   : > { %3075 = vmatmul.mubr.msk.bf16.vlgmr.msra.gmra.mrb[44].mxu0 %vm1062_vm5, %v2089_v1 }
0x10db   : > { %3085 = vmatpush3.bf16.msra.mxu0 %v2242_v4  ;;  %v2090_v5 = vpack.c.bf16 %v2086_v3, %v2086_v3  ;;  %3086 = vmatprep.mubr.msk.bf16.mxu0 %vm3328_vm0, %v3329_v12  ;;  %v2802_v4 = vld [vmem:[%s4106_s16 + $0x40] sm:$0xff] }
0x10dc   : > { %v3253_v6 = vpop.eup %3252  ;;  %3098 = vmatprep.subr.bf16.mxu0 %v3329_v12 }
0x10dd   : > { %v2087_v8 = vmul.f32 %v3253_v6, %v3245_v52  ;;  %3081 = vmatmul.mubr.msk.bf16.vlgmr.msra.gmra.mrb[36].mxu1 %vm1062_vm5, %v2090_v5  ;;  %v2803_v5 = vld [vmem:[%s4106_s16 + $0x48] sm:$0xff]  ;;  %v2804_v6 = vld [vmem:[%s4106_s16 + $0x50] sm:$0xff] }
0x10de   : > { %3094 = vmatprep.mubr.msk.bf16.mxu1 %vm3328_vm0, %v3329_v12  ;;  %3091 = vmatpush3.bf16.msra.mxu1 %v2305_v17  ;;  %v2471_v17 = vpack.c.bf16 %v2809_v16, %v2808_v15 }
0x10df   : > { %v2091_v9 = vpack.c.bf16 %v2087_v8, %v2087_v8  ;;  %3092 = vmatprep.subr.bf16.mxu1 %v3329_v12  ;;  %v2468_v8 = vpack.c.bf16 %v2803_v5, %v2802_v4  ;;  %v2562_v4 = vld [vmem:[%s4167_s3] sm:$0x1]  ;;  %s2660_s3 = scalar_lea.sflag [#allocation3], %s737_s29 }
0x10e2   : > { %3087 = vmatmul.mubr.msk.bf16.vlgmr.msra.gmra.mrb[48].mxu0 %vm1062_vm5, %v2091_v9  ;;  %3093 = vmatpush3.bf16.msra.mxu1 %v2306_v21  ;;  %v2805_v9 = vld [vmem:[%s4106_s16 + $0x58] sm:$0xff] }
0x10e3   : > { %3102 = vmatprep.mubr.msk.bf16.mxu0 %vm3328_vm0, %v3329_v12  ;;  %3106 = vmatprep.subr.bf16.mxu1 %v3329_v12 }
0x10e4   : > { %3099 = vmatpush3.bf16.msra.mxu0 %v2396_v58 }
0x10e5   : > { %3100 = vmatprep.subr.bf16.mxu0 %v3329_v12 }
0x1143   : > { %v2134_v10 = vpop.f32.mrb[32].mxu1 }
0x1144   : > { %v3070_v11 = vpop.f32.mrb[33].mxu1 }
0x1145   : > { %v2137_v13 = vpop.f32.mrb[34].mxu1  ;;  %v2806_v11 = vld [vmem:[%s4106_s16 + $0x60] sm:$0xff] }
0x1146   : > { %v3071_v14 = vpop.f32.mrb[35].mxu1  ;;  %v2807_v13 = vld [vmem:[%s4106_s16 + $0x68] sm:$0xff] }
0x1147   : > { %v2470_v14 = vpack.c.bf16 %v2807_v13, %v2806_v11  ;;  %v2614_v13 = vld [vmem:[%s4168_s25] sm:$0x1]  ;;  %s3268_s25 = scalar_lea.vmem %s3267_s27, 32 }
0x11ad   : > { %v2182_v22 = vpop.f32.mrb[44].mxu0 }
0x11ae   : > { %2285 = vrot.lane.b32.xlu0 %v2182_v22, %s4163_s5  ;;  %v3076_v23 = vpop.f32.mrb[45].mxu0 }
0x11af   : > { %v2185_v26 = vpop.f32.mrb[46].mxu0 }
0x11b0   : > { %v3077_v27 = vpop.f32.mrb[47].mxu0  ;;  %v2230_v28 = vpop.f32.mrb[36].mxu1 }
0x11b1   : > { %2289 = vrot.lane.b32.xlu1 %v2230_v28, %s4164_s28  ;;  %v3082_v29 = vpop.f32.mrb[37].mxu1  ;;  %s4166_s28 = sld [smem:[#allocation8_spill]] }
0x11b2   : > { %v2233_v30 = vpop.f32.mrb[38].mxu1 }
0x11b3   : > { %v3083_v31 = vpop.f32.mrb[39].mxu1 }
0x11b5   : > { %v2278_v32 = vpop.f32.mrb[48].mxu0 }
0x11b6   : > { %2293 = vrot.lane.b32.xlu0 %v2278_v32, %s4165_s21  ;;  %v3088_v7 = vpop.f32.mrb[49].mxu0  ;;  %s4170_s21 = sld [smem:[#allocation24_spill]] }
0x11b7   : > { %v2281_v33 = vpop.f32.mrb[50].mxu0  ;;  %s2819_s24 = sshll.u32 %s4166_s28, 4  ;;  %s3262_s28 = scalar_lea.vmem %s4050_s2, 16 }
0x11b8   : > { %v3089_v34 = vpop.f32.mrb[51].mxu0  ;;  %p3263_p11 = scmp.ne.s32.totalorder %s4050_s2, %s3262_s28  ;;  %p3270_p1 = scmp.lt.s32.totalorder %s3268_s25, %s3262_s28 }
0x11ba   : > { %p3264_p12 = pnand %p3263_p11, %p3503_p5  ;;  %p3271_p2 = por %p3270_p1, %p3269_p0 }
0x11bc   : > { %s4048_s6 = scalar_lea.hbm %s4170_s21, %s2819_s24  ;;  %p3265_p13 = pneg %p3264_p12 }
0x11be   : > { %p3272_p3 = pnand %p3271_p2, %p3265_p13 }
0x1220   : > { %v2286_v35 = vpop.permute.xlu0 %2285 }
0x1221   : > { %v2296_v36 = vsel %vm1062_vm5, %v2134_v10, %v2286_v35  ;;  %v2469_v10 = vpack.c.bf16 %v2805_v9, %v2804_v6 }
0x1223   : > { %v2290_v19 = vpop.permute.xlu1 %2289 }
0x1224   : > { %v2297_v25 = vsel %vm781_vm1, %v2296_v36, %v2290_v19  ;;  %v2811_v19 = vld [vmem:[%s4107_s17 + $0x1] ss:$0 sm:$0xff] }
0x1228   : > { %v2294_v24 = vpop.permute.xlu0 %2293 }
0x1229   : > { %v2298_v38 = vsel %vm1511_vm7, %v2297_v25, %v2294_v24 }
0x122a   : > { %v2299_v39 = vpack.c.bf16 %v2298_v38, %v2298_v38 }
0x122c   : > { %3095 = vmatmul.mubr.msk.bf16.vlgmr.msra.gmra.mrb[40].mxu1 %vm935_vm4, %v2299_v39 }
0x122d   : > { %3114 = vmatprep.mubr.msk.bf16.mxu1 %vm3328_vm0, %v3329_v12  ;;  %3107 = vmatpush3.bf16.msra.mxu1 %v2468_v8 }
0x122e   : > { %3108 = vmatprep.subr.bf16.mxu1 %v3329_v12 }
0x1231   : > { %3109 = vmatpush3.bf16.msra.mxu1 %v2469_v10 }
0x1232   : > { %3110 = vmatprep.subr.bf16.mxu1 %v3329_v12 }
0x1235   : > { %3111 = vmatpush3.bf16.msra.mxu1 %v2470_v14 }
0x1236   : > { %3112 = vmatprep.subr.bf16.mxu1 %v3329_v12 }
0x1239   : > { %3113 = vmatpush3.bf16.msra.mxu1 %v2471_v17 }
0x12ff   : > { %v2352_v41 = vpop.f32.mrb[40].mxu1 }
0x1300   : > { %v2353_v42 = vadd.f32 %v2789_v40, %v2352_v41  ;;  %v3096_v43 = vpop.f32.mrb[41].mxu1 }
0x1301   : > { %v2355_v44 = vpop.f32.mrb[42].mxu1 }
0x1302   : > { %v3097_v45 = vpop.f32.mrb[43].mxu1  ;;  %v2358_v46 = vadd.f32 %v2353_v42, %v3820_v37  ;;  %v2797_v37 = vld [vmem:[%s4104_s14 + $0x30] sm:$0xff] }
0x1303   : > { %v2397_v50 = vpack.c.bf16 %v2798_v59, %v2797_v37  ;;  %v2815_v59 = vld [vmem:[%s4108_s18 + $0x1] ss:$0 sm:$0xff] }
0x1304   : > { %v2363_v48 = vsel %vm935_vm4, %v2358_v46, 0.0 }
0x1305   : > { %2364 = vadd.xlane.f32.xlu1 %v2363_v48  ;;  %3101 = vmatpush3.bf16.msra.mxu0 %v2397_v50  ;;  %v2556_v48 = vld [vmem:[%s4110_s20] sm:$0xff] }
0x1306   : > { %3118 = vmatprep.subr.bf16.mxu0 %v3329_v12 }
0x1392   : > { %v2365_v49 = vpop.xlane.xlu1 %2364 }
0x1393   : > { %v2366_v52 = vmul.f32 0.03125, %v2365_v49  ;;  %v2557_v49 = vld [vmem:[%s4110_s20 + $0x8] sm:$0xff] }
0x1395   : > { %v2367_v53 = vsub.f32 %v2358_v46, %v2366_v52  ;;  %v2560_v52 = vpack.c.bf16 %v2557_v49, %v2556_v48 }
0x1397   : > { %v2368_v54 = vmul.f32 %v2367_v53, %v2367_v53 }
0x1399   : > { %v2369_v55 = vsel %vm935_vm4, %v2368_v54, 0.0  ;;  %v2559_v54 = vld [vmem:[%s4110_s20 + $0x18] sm:$0xff] }
0x139a   : > { %2370 = vadd.xlane.f32.xlu0 %v2369_v55 }
0x1427   : > { %v2371_v60 = vpop.xlane.xlu0 %2370 }
0x1428   : > { %v2372_v51 = vmul.f32 0.03125, %v2371_v60  ;;  %v2816_v60 = vld [vmem:[%s4109_s19 + $0x1] ss:$0 sm:$0xff] }
0x142a   : > { %v2373_v47 = vadd.f32 1e-12, %v2372_v51 }
0x142c   : > { %3254 = vrsqrt.f32 %v2373_v47 }
0x1436   : > { %v3255_v61 = vpop.eup %3254 }
0x1437   : > { %v2375_v63 = vmul.f32 %v3255_v61, %v2367_v53  ;;  %v2558_v53 = vld [vmem:[%s4110_s20 + $0x10] sm:$0xff] }
0x1438   : > { %v2561_v55 = vpack.c.bf16 %v2559_v54, %v2558_v53 }
0x1439   : > { %v2382_v1 = vmul.f32 %v2793_v62, %v2375_v63  ;;  %v2608_v62 = vld [vmem:[%s4112_s22] sm:$0xff]  ;;  %v2609_v63 = vld [vmem:[%s4112_s22 + $0x8] sm:$0xff] }
0x143b   : > { %v2389_v2 = vadd.f32 %v2794_v0, %v2382_v1  ;;  %v2612_v0 = vpack.c.bf16 %v2609_v63, %v2608_v62  ;;  %v2610_v1 = vld [vmem:[%s4112_s22 + $0x10] sm:$0xff] }
0x143d   : > { %v2390_v3 = vpack.c.bf16 %v2389_v2, %v2389_v2 }
0x143f   : > { %3103 = vmatmul.mubr.msk.bf16.vlgmr.msra.gmra.mrb[52].mxu0 %vm935_vm4, %v2390_v3 }
0x1440   : > { %3122 = vmatprep.mubr.msk.bf16.mxu0 %vm3328_vm0, %v3329_v12  ;;  %3119 = vmatpush3.bf16.msra.mxu0 %v2560_v52 }
0x1441   : > { %3120 = vmatprep.subr.bf16.mxu0 %v3329_v12 }
0x1444   : > { %3121 = vmatpush3.bf16.msra.mxu0 %v2561_v55 }
0x1445   : > { %3126 = vmatprep.subr.bf16.mxu0 %v3329_v12 }
0x1512   : > { %v2443_v20 = vpop.f32.mrb[52].mxu0 }
0x1513   : > { %v2444_v21 = vadd.f32 %v2800_v18, %v2443_v20  ;;  %v3104_v22 = vpop.f32.mrb[53].mxu0 }
0x1514   : > { %v2446_v23 = vpop.f32.mrb[54].mxu0 }
0x1515   : > { %v2450_v26 = vmul.f32 0.044715, %v2444_v21  ;;  %v3105_v27 = vpop.f32.mrb[55].mxu0  ;;  %v2449_v7 = vmul.f32 0.5, %v2444_v21 }
0x1517   : > { %v2451_v28 = vmul.f32 %v2450_v26, %v2444_v21 }
0x1519   : > { %v2452_v29 = vmul.f32 %v2451_v28, %v2444_v21 }
0x151b   : > { %v2453_v30 = vadd.f32 %v2452_v29, %v2444_v21 }
0x151d   : > { %v2454_v31 = vmul.f32 0.7978846, %v2453_v30 }
0x151f   : > { %3256 = vtanh.f32 %v2454_v31 }
0x1529   : > { %v3257_v32 = vpop.eup %3256 }
0x152a   : > { %v2456_v33 = vadd.f32 1.0, %v3257_v32 }
0x152c   : > { %v2457_v34 = vmul.f32 %v2456_v33, %v2449_v7 }
0x152e   : > { %v2458_v35 = vpack.c.bf16 %v2457_v34, %v2457_v34 }
0x1530   : > { %3115 = vmatmul.mubr.msk.bf16.vlgmr.msra.gmra.mrb[44].mxu1 %vm1686_vm8, %v2458_v35 }
0x1603   : > { %v2517_v36 = vpop.f32.mrb[44].mxu1 }
0x1604   : > { %v2518_v25 = vadd.f32 %v2811_v19, %v2517_v36  ;;  %v3116_v24 = vpop.f32.mrb[45].mxu1 }
0x1605   : > { %v2520_v38 = vpop.f32.mrb[46].mxu1 }
0x1606   : > { %v3117_v39 = vpop.f32.mrb[47].mxu1  ;;  %v2523_v40 = vadd.f32 %v2518_v25, %v2389_v2  ;;  %v2611_v2 = vld [vmem:[%s4112_s22 + $0x18] sm:$0xff] }
0x1607   : > { %v2613_v3 = vpack.c.bf16 %v2611_v2, %v2610_v1 }
0x1608   : > { %v2528_v41 = vsel %vm935_vm4, %v2523_v40, 0.0 }
0x1609   : > { %2529 = vadd.xlane.f32.xlu0 %v2528_v41 }
0x1696   : > { %v2530_v42 = vpop.xlane.xlu0 %2529 }
0x1697   : > { %v2531_v43 = vmul.f32 0.03125, %v2530_v42 }
0x1699   : > { %v2532_v44 = vsub.f32 %v2523_v40, %v2531_v43 }
0x169b   : > { %v2533_v45 = vmul.f32 %v2532_v44, %v2532_v44 }
0x169d   : > { %v2534_v46 = vsel %vm935_vm4, %v2533_v45, 0.0 }
0x169e   : > { %2535 = vadd.xlane.f32.xlu1 %v2534_v46 }
0x172b   : > { %v2536_v56 = vpop.xlane.xlu1 %2535 }
0x172c   : > { %v2537_v57 = vmul.f32 0.03125, %v2536_v56 }
0x172e   : > { %v2538_v58 = vadd.f32 1e-12, %v2537_v57 }
0x1730   : > { %3258 = vrsqrt.f32 %v2538_v58 }
0x173a   : > { %v3259_v37 = vpop.eup %3258 }
0x173b   : > { %v2540_v50 = vmul.f32 %v3259_v37, %v2532_v44 }
0x173d   : > { %v2547_v51 = vmul.f32 %v2815_v59, %v2540_v50 }
0x173f   : > { %v2554_v47 = vadd.f32 %v2816_v60, %v2547_v51 }
0x1741   : > { %v2555_v61 = vpack.c.bf16 %v2554_v47, %v2554_v47 }
0x1743   : > { %3123 = vmatmul.mubr.msk.bf16.vlgmr.msra.gmra.mrb[56].mxu0 %vm935_vm4, %v2555_v61 }
0x1744   : > { %3130 = vmatprep.mubr.msk.bf16.mxu0 %vm3328_vm0, %v3329_v12  ;;  %3127 = vmatpush3.bf16.msra.mxu0 %v2612_v0 }
0x1745   : > { %3128 = vmatprep.subr.bf16.mxu0 %v3329_v12 }
0x1748   : > { %3129 = vmatpush3.bf16.msra.mxu0 %v2613_v3 }
0x1816   : > { %v2600_v5 = vpop.f32.mrb[56].mxu0 }
0x1817   : > { %v2601_v6 = vadd.f32 %v2600_v5, %v2562_v4  ;;  %v3124_v8 = vpop.f32.mrb[57].mxu0 }
0x1818   : > { %v2603_v9 = vpop.f32.mrb[58].mxu0 }
0x1819   : > { %3260 = vtanh.f32 %v2601_v6  ;;  %v3125_v12 = vpop.f32.mrb[59].mxu0 }
0x1823   : > { %v3261_v10 = vpop.eup %3260 }
0x1824   : > { %v2607_v11 = vpack.c.bf16 %v3261_v10, %v3261_v10 }
0x1826   : > { %3131 = vmatmul.mubr.msk.bf16.vlgmr.msra.gmra.mrb[60].mxu0 %vm935_vm4, %v2607_v11 }
0x18f9   : > { %v2652_v14 = vpop.f32.mrb[60].mxu0 }
0x18fa   : > { %v2653_v15 = vadd.f32 %v2652_v14, %v2614_v13  ;;  %v3132_v16 = vpop.f32.mrb[61].mxu0 }
0x18fb   : > { %v2655_v17 = vpop.f32.mrb[62].mxu0 }
0x18fc   : > { %2658 = vst [vmem:[%s738_s0] sm:$0x1] %v2653_v15  ;;  %v3133_v18 = vpop.f32.mrb[63].mxu0 }
0x18fd   : > { %3275 = shalt.err (!%p3272_p3)
}
0x18fe   : > { %s3276_s29 = scalar_lea.hbm %s4048_s6, 16  ;;  %s3280_s23 = scalar_lea.hbm %s4170_s21, 32 }
0x18ff   : > { %p3277_p4 = scmp.ne.s32.totalorder %s4048_s6, %s3276_s29  ;;  %p3281_p9 = scmp.lt.u32.totalorder %s4048_s6, %s4170_s21 }
0x1900   : > { %p3282_p10 = scmp.lt.u32.totalorder %s3280_s23, %s3276_s29  ;;  %p3284_p12 = scmp.lt.u32.totalorder %s3276_s29, %s4048_s6 }
0x1901   : > { %p3278_p7 = pnand %p3277_p4, %p3503_p5 }
0x1902   : > { %p3283_p11 = por %p3282_p10, %p3281_p9 }
0x1903   : > { %p3279_p8 = pneg %p3278_p7 }
0x1904   : > { %p3285_p13 = por %p3284_p12, %p3283_p11 }
0x1906   : > { %p3286_p0 = pnand %p3285_p13, %p3279_p8 }
0x1908   : > { %3289 = shalt.err (!%p3286_p0)
}
0x1909   : > { %3161 = dma.vmem_to_hbm [thread:$0]  (%p3503_p5), %s4050_s2, 16, %s4048_s6, %s2660_s3  }
0x190a PF: > { %s4171_s28 = sld [smem:[#allocation7_spill]]  ;;  %s4172_s27 = sld [smem:[#allocation5_spill]] }
0x1910   : > { %p3167_p1 = scmp.ge.s32.totalorder %s4171_s28, 2  ;;  %s2684_s24 = sand.u32 1, %s4172_s27  }
0x1911   : > { %s2685_s0 = scalar_lea.sflag [#allocation3], %s2684_s24 }
0x1912   : > { %p3164_p2 = pnand %p3167_p1, %p3507_p6 }
0x1914   : > { %3307 = dma.done.wait (!%p3164_p2), %s2685_s0, 16  }
0x1915   : > { %3309 = vsyncadd (!%p3164_p2), %s2685_s0, 4294967280  ;;  %s4174_s28 = sld [smem:[#allocation9_spill]]  ;;  %s4175_s29 = sld [smem:[#allocation6_spill]] }
0x1916   : > { %s4176_s27 = sld [smem:[#allocation10_spill]]  ;;  %s4177_s5 = smov %s3316_s26 }
0x191b   : > { %p34_p3 = scmp.ge.s32.totalorder %s4174_s28, 4   ;;  %s4178_s26 = smov %s4175_s29 }
0x191d   :  { %36 = sbr.rel (!%p34_p3) target bundleno = 16 (0x10), region = 166 }
0x1924   :  { %2689 = vsyncpa [#allocation3], 1 }
0x1925   :  { %2691 = vsyncpa [#allocation3 + $0x1], 1 }

</bundles_post_ra>
